<compile_context>
chip_gen: v5e
topology: v5e:2x2
jax: 0.10.0
libtpu: 0.0.40
codegen_flags: <defaults>
</compile_context>

<pallas_src>
import functools

import jax
import jax.numpy as jnp
from jax import lax
from jax.experimental import pallas as pl
from jax.experimental.pallas import tpu as pltpu


def _round_up(x: int, m: int) -> int:
    return (x + m - 1) // m * m


def _seq_lstm_kernel(x_ref, h0_ref, c0_ref,
                     w_x_ref, w_h_ref, b_g_ref,
                     w_o_ref, b_o_ref,
                     y_ref, h_out_ref, c_out_ref,
                     h_s, c_s,
                     *, hidden_size: int, steps_full: int, steps_last: int,
                     unroll):
    """One chunk of LSTM time steps per grid iteration; (h, c) carried in VMEM scratch."""
    H = hidden_size
    chunk = pl.program_id(0)
    last_chunk = pl.num_programs(0) - 1

    @pl.when(chunk == 0)
    def _init():
        h_s[...] = h0_ref[...]
        c_s[...] = c0_ref[...]

    # Weights are resident in VMEM across the whole grid; load them once per chunk.
    w_x = w_x_ref[...]        # (C_in, 4H)
    w_h = w_h_ref[...]        # (H,   4H)
    b_g = b_g_ref[...]        # (1,   4H)   (= b_ih + b_hh)
    w_o = w_o_ref[...]        # (H,   O_pad)  (scale folded in)
    b_o = b_o_ref[...]        # (1,   O_pad)  (scale folded in)

    def run_chunk(n_steps):
        def step(t, carry):
            h, c = carry
            x_t = x_ref[t]                                   # (B, C_in)
            # gates = x_t @ W_ih^T + h @ W_hh^T + (b_ih + b_hh) -> (B, 4H), lane-dense.
            gates = (jnp.dot(x_t, w_x, preferred_element_type=jnp.float32)
                     + jnp.dot(h, w_h, preferred_element_type=jnp.float32)
                     + b_g)
            # Whole-block transcendentals (EUP), then static gate slices [i, f, g, o].
            sig = jax.nn.sigmoid(gates)
            th = jnp.tanh(gates)
            i_g = sig[:, 0 * H:1 * H]
            f_g = sig[:, 1 * H:2 * H]
            g_g = th[:, 2 * H:3 * H]
            o_g = sig[:, 3 * H:4 * H]
            c = f_g * c + i_g * g_g
            h = o_g * jnp.tanh(c)
            # mlp_out: LeakyReLU(0.01) -> Linear; scale pre-folded into w_o / b_o.
            act = jnp.where(h > 0, h, 0.01 * h)
            y_ref[t] = (jnp.dot(act, w_o, preferred_element_type=jnp.float32)
                        + b_o).astype(y_ref.dtype)
            return h, c

        h, c = lax.fori_loop(0, n_steps, step, (h_s[...], c_s[...]),
                             unroll=unroll)
        h_s[...] = h
        c_s[...] = c

    if steps_last == steps_full:
        # T divides evenly into chunks: single static-trip-count path.
        run_chunk(steps_full)
    else:
        @pl.when(chunk != last_chunk)
        def _full():
            run_chunk(steps_full)

        @pl.when(chunk == last_chunk)
        def _tail():
            run_chunk(steps_last)

    @pl.when(chunk == last_chunk)
    def _finalize():
        h_out_ref[...] = h_s[...].astype(h_out_ref.dtype)
        c_out_ref[...] = c_s[...].astype(c_out_ref.dtype)


def prepare_params(w_ih, w_hh, b_ih, b_hh, w_out, b_out, scale):
    """One-time parameter prep: transpose, sum biases, fold scale, pad O to 128 lanes."""
    H = w_hh.shape[1]
    O = w_out.shape[0]
    O_pad = _round_up(max(O, 1), 128)
    w_x = jnp.asarray(w_ih, jnp.float32).T                       # (C_in, 4H)
    w_h = jnp.asarray(w_hh, jnp.float32).T                       # (H, 4H)
    b_g = (b_ih + b_hh).astype(jnp.float32).reshape(1, 4 * H)    # (1, 4H)
    w_o = jnp.zeros((H, O_pad), jnp.float32).at[:, :O].set((w_out * scale).T)
    b_o = jnp.zeros((1, O_pad), jnp.float32).at[0, :O].set(b_out * scale)
    return dict(w_x=w_x, w_h=w_h, b_g=b_g, w_o=w_o, b_o=b_o, out_channels=O)


def sequential_lstm_sequence(x_btc, h0, c0, params, *, time_chunk=32):
    """T successive forward() calls of the module, fused in one Pallas kernel.

    x_btc: (B, T, C_in)  (batch_first, like the PyTorch module)
    Returns (y: (B, T, O), h_T: (B, H), c_T: (B, H)).
    """
    w_x, w_h, b_g = params["w_x"], params["w_h"], params["b_g"]
    w_o, b_o, O = params["w_o"], params["b_o"], params["out_channels"]
    B, T, C = x_btc.shape
    H = h0.shape[-1]
    O_pad = w_o.shape[1]

    TC = max(1, min(T, time_chunk))
    num_chunks = pl.cdiv(T, TC)
    steps_last = T - (num_chunks - 1) * TC
    T_pad = num_chunks * TC

    # (T, B, C): contiguous per-chunk blocks over the (padded) time axis.
    x_tbc = jnp.swapaxes(x_btc, 0, 1)
    if T_pad != T:
        x_tbc = jnp.concatenate(
            [x_tbc, jnp.zeros((T_pad - T, B, C), x_tbc.dtype)], axis=0)

    kernel = functools.partial(
        _seq_lstm_kernel, hidden_size=H,
        steps_full=TC, steps_last=steps_last, unroll=True)
    const = lambda i: (0, 0)   # resident across all grid steps (DMA'd once)

    y_pad, h_f, c_f = pl.pallas_call(
        kernel,
        grid=(num_chunks,),
        in_specs=[
            pl.BlockSpec((TC, B, C), lambda i: (i, 0, 0)),   # x chunk
            pl.BlockSpec((B, H), const),                     # h0
            pl.BlockSpec((B, H), const),                     # c0
            pl.BlockSpec((C, 4 * H), const),                 # W_ih^T   (resident)
            pl.BlockSpec((H, 4 * H), const),                 # W_hh^T   (resident)
            pl.BlockSpec((1, 4 * H), const),                 # b_ih + b_hh
            pl.BlockSpec((H, O_pad), const),                 # scale * W_out^T (lane-padded)
            pl.BlockSpec((1, O_pad), const),                 # scale * b_out   (lane-padded)
        ],
        out_specs=(
            pl.BlockSpec((TC, B, O_pad), lambda i: (i, 0, 0)),
            pl.BlockSpec((B, H), const),
            pl.BlockSpec((B, H), const),
        ),
        out_shape=(
            jax.ShapeDtypeStruct((T_pad, B, O_pad), jnp.float32),
            jax.ShapeDtypeStruct((B, H), jnp.float32),
            jax.ShapeDtypeStruct((B, H), jnp.float32),
        ),
        scratch_shapes=[pltpu.VMEM((B, H), jnp.float32),   # h carry
                        pltpu.VMEM((B, H), jnp.float32)],  # c carry
        compiler_params=pltpu.CompilerParams(
            dimension_semantics=("arbitrary",)),           # sequential carry over time
    )(x_tbc, h0, c0, w_x, w_h, b_g, w_o, b_o)

    y = jnp.swapaxes(y_pad[:T, :, :O], 0, 1)               # (B, T, O)
    return y, h_f, c_f


def sequential_lstm_step(x, h0, c0, params):
    """Single forward() call of the PyTorch module (T = 1); returns (y, h_new, c_new)."""
    y, h, c = sequential_lstm_sequence(x[:, None, :], h0, c0, params)
    return y[:, 0, :], h, c


def _reference_sequence(x_btc, h0, c0, raw_params, scale):
    """Pure-JAX reference mirroring torch.nn.LSTM (1 layer) + mlp_out, step by step."""
    w_ih, w_hh, b_ih, b_hh, w_out, b_out = raw_params
    H = h0.shape[-1]

    def step(carry, x_t):
        h, c = carry
        gates = x_t @ w_ih.T + b_ih + h @ w_hh.T + b_hh
        i = jax.nn.sigmoid(gates[:, 0 * H:1 * H])
        f = jax.nn.sigmoid(gates[:, 1 * H:2 * H])
        g = jnp.tanh(gates[:, 2 * H:3 * H])
        o = jax.nn.sigmoid(gates[:, 3 * H:4 * H])
        c = f * c + i * g
        h = o * jnp.tanh(c)
        act = jnp.where(h > 0, h, 0.01 * h)
        y = (act @ w_out.T + b_out) * scale
        return (h, c), y

    (h_f, c_f), ys = jax.lax.scan(step, (h0, c0), jnp.swapaxes(x_btc, 0, 1))
    return jnp.swapaxes(ys, 0, 1), h_f, c_f


if __name__ == "__main__":
    # Small shapes consistent with the module: per-step x is (batch, in_channels).
    B, C_IN, H, O, T = 2, 4, 32, 4, 8
    SCALE = 1.5

    key = jax.random.PRNGKey(0)
    ks = jax.random.split(key, 9)

    # PyTorch-style init: U(-1/sqrt(H), 1/sqrt(H)) for both the LSTM and output Linear.
    bound = 1.0 / jnp.sqrt(jnp.float32(H))
    w_ih = jax.random.uniform(ks[0], (4 * H, C_IN), jnp.float32, -bound, bound)
    w_hh = jax.random.uniform(ks[1], (4 * H, H), jnp.float32, -bound, bound)
    b_ih = jax.random.uniform(ks[2], (4 * H,), jnp.float32, -bound, bound)
    b_hh = jax.random.uniform(ks[3], (4 * H,), jnp.float32, -bound, bound)
    w_out = jax.random.uniform(ks[4], (O, H), jnp.float32, -bound, bound)
    b_out = jax.random.uniform(ks[5], (O,), jnp.float32, -bound, bound)
    raw_params = (w_ih, w_hh, b_ih, b_hh, w_out, b_out)

    params = prepare_params(w_ih, w_hh, b_ih, b_hh, w_out, b_out, SCALE)

    x_seq = jax.random.normal(ks[6], (B, T, C_IN), jnp.float32)
    # First forward(): hidden is None -> zeros (num_layers=1 squeezed away).
    h0 = jnp.zeros((B, H), jnp.float32)
    c0 = jnp.zeros((B, H), jnp.float32)

    # Fused sequence == T successive forward() calls with the internal state carried.
    y_seq, h_T, c_T = sequential_lstm_sequence(x_seq, h0, c0, params)
    jax.block_until_ready((y_seq, h_T, c_T))

    y_ref, h_ref, c_ref = _reference_sequence(x_seq, h0, c0, raw_params, SCALE)
    assert jnp.allclose(y_seq, y_ref, atol=1e-4, rtol=1e-4)
    assert jnp.allclose(h_T, h_ref, atol=1e-4, rtol=1e-4)
    assert jnp.allclose(c_T, c_ref, atol=1e-4, rtol=1e-4)

    # Module-style single-step forward(), re-using the returned state (T = 1 case).
    x_step = jax.random.normal(ks[7], (B, C_IN), jnp.float32)
    y1, h1, c1 = sequential_lstm_step(x_step, h_T, c_T, params)
    jax.block_until_ready((y1, h1, c1))
    y1_ref, h1_ref, c1_ref = _reference_sequence(
        x_step[:, None, :], h_T, c_T, raw_params, SCALE)
    assert jnp.allclose(y1, y1_ref[:, 0, :], atol=1e-4, rtol=1e-4)
    assert jnp.allclose(h1, h1_ref, atol=1e-4, rtol=1e-4)
    assert jnp.allclose(c1, c1_ref, atol=1e-4, rtol=1e-4)

    # Ragged-length sequence (exercises the static tail-chunk branch: 37 = 32 + 5).
    T2 = 37
    x_long = jax.random.normal(ks[8], (B, T2, C_IN), jnp.float32)
    y2, h2, c2 = sequential_lstm_sequence(x_long, h0, c0, params)
    jax.block_until_ready((y2, h2, c2))
    y2_ref, h2_ref, c2_ref = _reference_sequence(x_long, h0, c0, raw_params, SCALE)
    assert jnp.allclose(y2, y2_ref, atol=1e-4, rtol=1e-4)
    assert jnp.allclose(h2, h2_ref, atol=1e-4, rtol=1e-4)
    assert jnp.allclose(c2, c2_ref, atol=1e-4, rtol=1e-4)

    print("KERNEL_OK")
</pallas_src>

<mosaic_0001>
module attributes {stable_mosaic.version = 11 : i64} {
  func.func @_seq_lstm_kernel(%arg0: i32, %arg1: memref<8x2x4xf32, #tpu.memory_space<vmem>>, %arg2: memref<2x32xf32, #tpu.memory_space<vmem>>, %arg3: memref<2x32xf32, #tpu.memory_space<vmem>>, %arg4: memref<4x128xf32, #tpu.memory_space<vmem>>, %arg5: memref<32x128xf32, #tpu.memory_space<vmem>>, %arg6: memref<1x128xf32, #tpu.memory_space<vmem>>, %arg7: memref<32x128xf32, #tpu.memory_space<vmem>>, %arg8: memref<1x128xf32, #tpu.memory_space<vmem>>, %arg9: memref<8x2x128xf32, #tpu.memory_space<vmem>>, %arg10: memref<2x32xf32, #tpu.memory_space<vmem>>, %arg11: memref<2x32xf32, #tpu.memory_space<vmem>>, %arg12: memref<2x32xf32, #tpu.memory_space<vmem>>, %arg13: memref<2x32xf32, #tpu.memory_space<vmem>>) attributes {dimension_semantics = [#tpu.dimension_semantics<arbitrary>], iteration_bounds = array<i64: 1>, scalar_prefetch = 0 : i64, scratch_operands = 2 : i64, tpu.core_type = #tpu.core_type<tc>, window_params = [{transform_indices = @transform_0, window_bounds = array<i64: 8, 2, 4>}, {pipeline_mode = #tpu.pipeline_mode<synchronous>, transform_indices = @transform_1, window_bounds = array<i64: 2, 32>}, {pipeline_mode = #tpu.pipeline_mode<synchronous>, transform_indices = @transform_2, window_bounds = array<i64: 2, 32>}, {pipeline_mode = #tpu.pipeline_mode<synchronous>, transform_indices = @transform_3, window_bounds = array<i64: 4, 128>}, {pipeline_mode = #tpu.pipeline_mode<synchronous>, transform_indices = @transform_4, window_bounds = array<i64: 32, 128>}, {pipeline_mode = #tpu.pipeline_mode<synchronous>, transform_indices = @transform_5, window_bounds = array<i64: 1, 128>}, {pipeline_mode = #tpu.pipeline_mode<synchronous>, transform_indices = @transform_6, window_bounds = array<i64: 32, 128>}, {pipeline_mode = #tpu.pipeline_mode<synchronous>, transform_indices = @transform_7, window_bounds = array<i64: 1, 128>}, {transform_indices = @transform_8, window_bounds = array<i64: 8, 2, 128>}, {pipeline_mode = #tpu.pipeline_mode<synchronous>, transform_indices = @transform_9, window_bounds = array<i64: 2, 32>}, {pipeline_mode = #tpu.pipeline_mode<synchronous>, transform_indices = @transform_10, window_bounds = array<i64: 2, 32>}]} {
    %c0_i32 = arith.constant 0 : i32
    %0 = arith.cmpi eq, %arg0, %c0_i32 : i32
    %1 = arith.extui %0 : i1 to i32
    %c0_i32_0 = arith.constant 0 : i32
    %2 = arith.cmpi ne, %1, %c0_i32_0 : i32
    scf.if %2 {
      %c0_100 = arith.constant 0 : index
      %c0_101 = arith.constant 0 : index
      %295 = vector.load %arg2[%c0_100, %c0_101] : memref<2x32xf32, #tpu.memory_space<vmem>>, vector<2x32xf32>
      %c0_102 = arith.constant 0 : index
      %c0_103 = arith.constant 0 : index
      %296 = vector.load %arg12[%c0_102, %c0_103] : memref<2x32xf32, #tpu.memory_space<vmem>>, vector<2x32xf32>
      tpu.vector_store %arg12[%c0_102, %c0_103], %295 {strides = array<i32>} : memref<2x32xf32, #tpu.memory_space<vmem>>, vector<2x32xf32>,
      %c0_104 = arith.constant 0 : index
      %c0_105 = arith.constant 0 : index
      %297 = vector.load %arg3[%c0_104, %c0_105] : memref<2x32xf32, #tpu.memory_space<vmem>>, vector<2x32xf32>
      %c0_106 = arith.constant 0 : index
      %c0_107 = arith.constant 0 : index
      %298 = vector.load %arg13[%c0_106, %c0_107] : memref<2x32xf32, #tpu.memory_space<vmem>>, vector<2x32xf32>
      tpu.vector_store %arg13[%c0_106, %c0_107], %297 {strides = array<i32>} : memref<2x32xf32, #tpu.memory_space<vmem>>, vector<2x32xf32>,
    } else {
    }
    %c0 = arith.constant 0 : index
    %c0_1 = arith.constant 0 : index
    %3 = vector.load %arg4[%c0, %c0_1] : memref<4x128xf32, #tpu.memory_space<vmem>>, vector<4x128xf32>
    %c0_2 = arith.constant 0 : index
    %c0_3 = arith.constant 0 : index
    %4 = vector.load %arg5[%c0_2, %c0_3] : memref<32x128xf32, #tpu.memory_space<vmem>>, vector<32x128xf32>
    %c0_4 = arith.constant 0 : index
    %c0_5 = arith.constant 0 : index
    %5 = vector.load %arg6[%c0_4, %c0_5] : memref<1x128xf32, #tpu.memory_space<vmem>>, vector<1x128xf32>
    %c0_6 = arith.constant 0 : index
    %c0_7 = arith.constant 0 : index
    %6 = vector.load %arg7[%c0_6, %c0_7] : memref<32x128xf32, #tpu.memory_space<vmem>>, vector<32x128xf32>
    %c0_8 = arith.constant 0 : index
    %c0_9 = arith.constant 0 : index
    %7 = vector.load %arg8[%c0_8, %c0_9] : memref<1x128xf32, #tpu.memory_space<vmem>>, vector<1x128xf32>
    %c0_10 = arith.constant 0 : index
    %c0_11 = arith.constant 0 : index
    %8 = vector.load %arg12[%c0_10, %c0_11] : memref<2x32xf32, #tpu.memory_space<vmem>>, vector<2x32xf32>
    %c0_12 = arith.constant 0 : index
    %c0_13 = arith.constant 0 : index
    %9 = vector.load %arg13[%c0_12, %c0_13] : memref<2x32xf32, #tpu.memory_space<vmem>>, vector<2x32xf32>
    %c0_i32_14 = arith.constant 0 : i32
    %10 = arith.index_cast %c0_i32_14 : i32 to index
    %c0_15 = arith.constant 0 : index
    %c0_16 = arith.constant 0 : index
    %11 = vector.load %arg1[%10, %c0_15, %c0_16] : memref<8x2x4xf32, #tpu.memory_space<vmem>>, vector<1x2x4xf32>
    %12 = vector.shape_cast %11 : vector<1x2x4xf32> to vector<2x4xf32>
    %cst = arith.constant dense<0.000000e+00> : vector<2x128xf32>
    %13 = tpu.matmul %12, %3, %cst {dimension_numbers = #tpu.dot_dimension_numbers<[1], [0], [0], [1], [0, 0, 1, 1], [], []>} : vector<2x4xf32>, vector<4x128xf32>, vector<2x128xf32> -> vector<2x128xf32>
    %cst_17 = arith.constant dense<0.000000e+00> : vector<2x128xf32>
    %14 = tpu.matmul %8, %4, %cst_17 {dimension_numbers = #tpu.dot_dimension_numbers<[1], [0], [0], [1], [0, 0, 1, 1], [], []>} : vector<2x32xf32>, vector<32x128xf32>, vector<2x128xf32> -> vector<2x128xf32>
    %15 = arith.addf %13, %14 : vector<2x128xf32>
    %16 = vector.broadcast %5 : vector<1x128xf32> to vector<2x128xf32>
    %17 = arith.addf %15, %16 : vector<2x128xf32>
    %18 = arith.negf %17 : vector<2x128xf32>
    %19 = math.exp %18 : vector<2x128xf32>
    %cst_18 = arith.constant 1.000000e+00 : f32
    %20 = vector.broadcast %cst_18 : f32 to vector<2x128xf32>
    %21 = arith.addf %20, %19 : vector<2x128xf32>
    %22 = arith.divf %20, %21 : vector<2x128xf32>
    %23 = math.tanh %17 : vector<2x128xf32>
    %24 = vector.extract_strided_slice %22 {offsets = [0, 0], sizes = [2, 32], strides = [1, 1]} : vector<2x128xf32> to vector<2x32xf32>
    %25 = vector.extract_strided_slice %22 {offsets = [0, 32], sizes = [2, 32], strides = [1, 1]} : vector<2x128xf32> to vector<2x32xf32>
    %26 = vector.extract_strided_slice %23 {offsets = [0, 64], sizes = [2, 32], strides = [1, 1]} : vector<2x128xf32> to vector<2x32xf32>
    %27 = vector.extract_strided_slice %22 {offsets = [0, 96], sizes = [2, 32], strides = [1, 1]} : vector<2x128xf32> to vector<2x32xf32>
    %28 = arith.mulf %25, %9 : vector<2x32xf32>
    %29 = arith.mulf %24, %26 : vector<2x32xf32>
    %30 = arith.addf %28, %29 : vector<2x32xf32>
    %31 = math.tanh %30 : vector<2x32xf32>
    %32 = arith.mulf %27, %31 : vector<2x32xf32>
    %cst_19 = arith.constant 0.000000e+00 : f32
    %33 = vector.broadcast %cst_19 : f32 to vector<2x32xf32>
    %34 = arith.cmpf ogt, %32, %33 : vector<2x32xf32>
    %cst_20 = arith.constant 0.00999999977 : f32
    %35 = vector.broadcast %cst_20 : f32 to vector<2x32xf32>
    %36 = arith.mulf %35, %32 : vector<2x32xf32>
    %37 = arith.select %34, %32, %36 : vector<2x32xi1>, vector<2x32xf32>
    %cst_21 = arith.constant dense<0.000000e+00> : vector<2x128xf32>
    %38 = tpu.matmul %37, %6, %cst_21 {dimension_numbers = #tpu.dot_dimension_numbers<[1], [0], [0], [1], [0, 0, 1, 1], [], []>} : vector<2x32xf32>, vector<32x128xf32>, vector<2x128xf32> -> vector<2x128xf32>
    %39 = vector.broadcast %7 : vector<1x128xf32> to vector<2x128xf32>
    %40 = arith.addf %38, %39 : vector<2x128xf32>
    %41 = arith.index_cast %c0_i32_14 : i32 to index
    %c0_22 = arith.constant 0 : index
    %c0_23 = arith.constant 0 : index
    %42 = vector.load %arg9[%41, %c0_22, %c0_23] : memref<8x2x128xf32, #tpu.memory_space<vmem>>, vector<1x2x128xf32>
    %43 = vector.shape_cast %42 : vector<1x2x128xf32> to vector<2x128xf32>
    %44 = vector.shape_cast %40 : vector<2x128xf32> to vector<1x2x128xf32>
    tpu.vector_store %arg9[%41, %c0_22, %c0_23], %44 {strides = array<i32>} : memref<8x2x128xf32, #tpu.memory_space<vmem>>, vector<1x2x128xf32>,
    %c1_i32 = arith.constant 1 : i32
    %45 = arith.index_cast %c1_i32 : i32 to index
    %c0_24 = arith.constant 0 : index
    %c0_25 = arith.constant 0 : index
    %46 = vector.load %arg1[%45, %c0_24, %c0_25] : memref<8x2x4xf32, #tpu.memory_space<vmem>>, vector<1x2x4xf32>
    %47 = vector.shape_cast %46 : vector<1x2x4xf32> to vector<2x4xf32>
    %cst_26 = arith.constant dense<0.000000e+00> : vector<2x128xf32>
    %48 = tpu.matmul %47, %3, %cst_26 {dimension_numbers = #tpu.dot_dimension_numbers<[1], [0], [0], [1], [0, 0, 1, 1], [], []>} : vector<2x4xf32>, vector<4x128xf32>, vector<2x128xf32> -> vector<2x128xf32>
    %cst_27 = arith.constant dense<0.000000e+00> : vector<2x128xf32>
    %49 = tpu.matmul %32, %4, %cst_27 {dimension_numbers = #tpu.dot_dimension_numbers<[1], [0], [0], [1], [0, 0, 1, 1], [], []>} : vector<2x32xf32>, vector<32x128xf32>, vector<2x128xf32> -> vector<2x128xf32>
    %50 = arith.addf %48, %49 : vector<2x128xf32>
    %51 = vector.broadcast %5 : vector<1x128xf32> to vector<2x128xf32>
    %52 = arith.addf %50, %51 : vector<2x128xf32>
    %53 = arith.negf %52 : vector<2x128xf32>
    %54 = math.exp %53 : vector<2x128xf32>
    %cst_28 = arith.constant 1.000000e+00 : f32
    %55 = vector.broadcast %cst_28 : f32 to vector<2x128xf32>
    %56 = arith.addf %55, %54 : vector<2x128xf32>
    %57 = arith.divf %55, %56 : vector<2x128xf32>
    %58 = math.tanh %52 : vector<2x128xf32>
    %59 = vector.extract_strided_slice %57 {offsets = [0, 0], sizes = [2, 32], strides = [1, 1]} : vector<2x128xf32> to vector<2x32xf32>
    %60 = vector.extract_strided_slice %57 {offsets = [0, 32], sizes = [2, 32], strides = [1, 1]} : vector<2x128xf32> to vector<2x32xf32>
    %61 = vector.extract_strided_slice %58 {offsets = [0, 64], sizes = [2, 32], strides = [1, 1]} : vector<2x128xf32> to vector<2x32xf32>
    %62 = vector.extract_strided_slice %57 {offsets = [0, 96], sizes = [2, 32], strides = [1, 1]} : vector<2x128xf32> to vector<2x32xf32>
    %63 = arith.mulf %60, %30 : vector<2x32xf32>
    %64 = arith.mulf %59, %61 : vector<2x32xf32>
    %65 = arith.addf %63, %64 : vector<2x32xf32>
    %66 = math.tanh %65 : vector<2x32xf32>
    %67 = arith.mulf %62, %66 : vector<2x32xf32>
    %cst_29 = arith.constant 0.000000e+00 : f32
    %68 = vector.broadcast %cst_29 : f32 to vector<2x32xf32>
    %69 = arith.cmpf ogt, %67, %68 : vector<2x32xf32>
    %cst_30 = arith.constant 0.00999999977 : f32
    %70 = vector.broadcast %cst_30 : f32 to vector<2x32xf32>
    %71 = arith.mulf %70, %67 : vector<2x32xf32>
    %72 = arith.select %69, %67, %71 : vector<2x32xi1>, vector<2x32xf32>
    %cst_31 = arith.constant dense<0.000000e+00> : vector<2x128xf32>
    %73 = tpu.matmul %72, %6, %cst_31 {dimension_numbers = #tpu.dot_dimension_numbers<[1], [0], [0], [1], [0, 0, 1, 1], [], []>} : vector<2x32xf32>, vector<32x128xf32>, vector<2x128xf32> -> vector<2x128xf32>
    %74 = vector.broadcast %7 : vector<1x128xf32> to vector<2x128xf32>
    %75 = arith.addf %73, %74 : vector<2x128xf32>
    %76 = arith.index_cast %c1_i32 : i32 to index
    %c0_32 = arith.constant 0 : index
    %c0_33 = arith.constant 0 : index
    %77 = vector.load %arg9[%76, %c0_32, %c0_33] : memref<8x2x128xf32, #tpu.memory_space<vmem>>, vector<1x2x128xf32>
    %78 = vector.shape_cast %77 : vector<1x2x128xf32> to vector<2x128xf32>
    %79 = vector.shape_cast %75 : vector<2x128xf32> to vector<1x2x128xf32>
    tpu.vector_store %arg9[%76, %c0_32, %c0_33], %79 {strides = array<i32>} : memref<8x2x128xf32, #tpu.memory_space<vmem>>, vector<1x2x128xf32>,
    %c2_i32 = arith.constant 2 : i32
    %80 = arith.index_cast %c2_i32 : i32 to index
    %c0_34 = arith.constant 0 : index
    %c0_35 = arith.constant 0 : index
    %81 = vector.load %arg1[%80, %c0_34, %c0_35] : memref<8x2x4xf32, #tpu.memory_space<vmem>>, vector<1x2x4xf32>
    %82 = vector.shape_cast %81 : vector<1x2x4xf32> to vector<2x4xf32>
    %cst_36 = arith.constant dense<0.000000e+00> : vector<2x128xf32>
    %83 = tpu.matmul %82, %3, %cst_36 {dimension_numbers = #tpu.dot_dimension_numbers<[1], [0], [0], [1], [0, 0, 1, 1], [], []>} : vector<2x4xf32>, vector<4x128xf32>, vector<2x128xf32> -> vector<2x128xf32>
    %cst_37 = arith.constant dense<0.000000e+00> : vector<2x128xf32>
    %84 = tpu.matmul %67, %4, %cst_37 {dimension_numbers = #tpu.dot_dimension_numbers<[1], [0], [0], [1], [0, 0, 1, 1], [], []>} : vector<2x32xf32>, vector<32x128xf32>, vector<2x128xf32> -> vector<2x128xf32>
    %85 = arith.addf %83, %84 : vector<2x128xf32>
    %86 = vector.broadcast %5 : vector<1x128xf32> to vector<2x128xf32>
    %87 = arith.addf %85, %86 : vector<2x128xf32>
    %88 = arith.negf %87 : vector<2x128xf32>
    %89 = math.exp %88 : vector<2x128xf32>
    %cst_38 = arith.constant 1.000000e+00 : f32
    %90 = vector.broadcast %cst_38 : f32 to vector<2x128xf32>
    %91 = arith.addf %90, %89 : vector<2x128xf32>
    %92 = arith.divf %90, %91 : vector<2x128xf32>
    %93 = math.tanh %87 : vector<2x128xf32>
    %94 = vector.extract_strided_slice %92 {offsets = [0, 0], sizes = [2, 32], strides = [1, 1]} : vector<2x128xf32> to vector<2x32xf32>
    %95 = vector.extract_strided_slice %92 {offsets = [0, 32], sizes = [2, 32], strides = [1, 1]} : vector<2x128xf32> to vector<2x32xf32>
    %96 = vector.extract_strided_slice %93 {offsets = [0, 64], sizes = [2, 32], strides = [1, 1]} : vector<2x128xf32> to vector<2x32xf32>
    %97 = vector.extract_strided_slice %92 {offsets = [0, 96], sizes = [2, 32], strides = [1, 1]} : vector<2x128xf32> to vector<2x32xf32>
    %98 = arith.mulf %95, %65 : vector<2x32xf32>
    %99 = arith.mulf %94, %96 : vector<2x32xf32>
    %100 = arith.addf %98, %99 : vector<2x32xf32>
    %101 = math.tanh %100 : vector<2x32xf32>
    %102 = arith.mulf %97, %101 : vector<2x32xf32>
    %cst_39 = arith.constant 0.000000e+00 : f32
    %103 = vector.broadcast %cst_39 : f32 to vector<2x32xf32>
    %104 = arith.cmpf ogt, %102, %103 : vector<2x32xf32>
    %cst_40 = arith.constant 0.00999999977 : f32
    %105 = vector.broadcast %cst_40 : f32 to vector<2x32xf32>
    %106 = arith.mulf %105, %102 : vector<2x32xf32>
    %107 = arith.select %104, %102, %106 : vector<2x32xi1>, vector<2x32xf32>
    %cst_41 = arith.constant dense<0.000000e+00> : vector<2x128xf32>
    %108 = tpu.matmul %107, %6, %cst_41 {dimension_numbers = #tpu.dot_dimension_numbers<[1], [0], [0], [1], [0, 0, 1, 1], [], []>} : vector<2x32xf32>, vector<32x128xf32>, vector<2x128xf32> -> vector<2x128xf32>
    %109 = vector.broadcast %7 : vector<1x128xf32> to vector<2x128xf32>
    %110 = arith.addf %108, %109 : vector<2x128xf32>
    %111 = arith.index_cast %c2_i32 : i32 to index
    %c0_42 = arith.constant 0 : index
    %c0_43 = arith.constant 0 : index
    %112 = vector.load %arg9[%111, %c0_42, %c0_43] : memref<8x2x128xf32, #tpu.memory_space<vmem>>, vector<1x2x128xf32>
    %113 = vector.shape_cast %112 : vector<1x2x128xf32> to vector<2x128xf32>
    %114 = vector.shape_cast %110 : vector<2x128xf32> to vector<1x2x128xf32>
    tpu.vector_store %arg9[%111, %c0_42, %c0_43], %114 {strides = array<i32>} : memref<8x2x128xf32, #tpu.memory_space<vmem>>, vector<1x2x128xf32>,
    %c3_i32 = arith.constant 3 : i32
    %115 = arith.index_cast %c3_i32 : i32 to index
    %c0_44 = arith.constant 0 : index
    %c0_45 = arith.constant 0 : index
    %116 = vector.load %arg1[%115, %c0_44, %c0_45] : memref<8x2x4xf32, #tpu.memory_space<vmem>>, vector<1x2x4xf32>
    %117 = vector.shape_cast %116 : vector<1x2x4xf32> to vector<2x4xf32>
    %cst_46 = arith.constant dense<0.000000e+00> : vector<2x128xf32>
    %118 = tpu.matmul %117, %3, %cst_46 {dimension_numbers = #tpu.dot_dimension_numbers<[1], [0], [0], [1], [0, 0, 1, 1], [], []>} : vector<2x4xf32>, vector<4x128xf32>, vector<2x128xf32> -> vector<2x128xf32>
    %cst_47 = arith.constant dense<0.000000e+00> : vector<2x128xf32>
    %119 = tpu.matmul %102, %4, %cst_47 {dimension_numbers = #tpu.dot_dimension_numbers<[1], [0], [0], [1], [0, 0, 1, 1], [], []>} : vector<2x32xf32>, vector<32x128xf32>, vector<2x128xf32> -> vector<2x128xf32>
    %120 = arith.addf %118, %119 : vector<2x128xf32>
    %121 = vector.broadcast %5 : vector<1x128xf32> to vector<2x128xf32>
    %122 = arith.addf %120, %121 : vector<2x128xf32>
    %123 = arith.negf %122 : vector<2x128xf32>
    %124 = math.exp %123 : vector<2x128xf32>
    %cst_48 = arith.constant 1.000000e+00 : f32
    %125 = vector.broadcast %cst_48 : f32 to vector<2x128xf32>
    %126 = arith.addf %125, %124 : vector<2x128xf32>
    %127 = arith.divf %125, %126 : vector<2x128xf32>
    %128 = math.tanh %122 : vector<2x128xf32>
    %129 = vector.extract_strided_slice %127 {offsets = [0, 0], sizes = [2, 32], strides = [1, 1]} : vector<2x128xf32> to vector<2x32xf32>
    %130 = vector.extract_strided_slice %127 {offsets = [0, 32], sizes = [2, 32], strides = [1, 1]} : vector<2x128xf32> to vector<2x32xf32>
    %131 = vector.extract_strided_slice %128 {offsets = [0, 64], sizes = [2, 32], strides = [1, 1]} : vector<2x128xf32> to vector<2x32xf32>
    %132 = vector.extract_strided_slice %127 {offsets = [0, 96], sizes = [2, 32], strides = [1, 1]} : vector<2x128xf32> to vector<2x32xf32>
    %133 = arith.mulf %130, %100 : vector<2x32xf32>
    %134 = arith.mulf %129, %131 : vector<2x32xf32>
    %135 = arith.addf %133, %134 : vector<2x32xf32>
    %136 = math.tanh %135 : vector<2x32xf32>
    %137 = arith.mulf %132, %136 : vector<2x32xf32>
    %cst_49 = arith.constant 0.000000e+00 : f32
    %138 = vector.broadcast %cst_49 : f32 to vector<2x32xf32>
    %139 = arith.cmpf ogt, %137, %138 : vector<2x32xf32>
    %cst_50 = arith.constant 0.00999999977 : f32
    %140 = vector.broadcast %cst_50 : f32 to vector<2x32xf32>
    %141 = arith.mulf %140, %137 : vector<2x32xf32>
    %142 = arith.select %139, %137, %141 : vector<2x32xi1>, vector<2x32xf32>
    %cst_51 = arith.constant dense<0.000000e+00> : vector<2x128xf32>
    %143 = tpu.matmul %142, %6, %cst_51 {dimension_numbers = #tpu.dot_dimension_numbers<[1], [0], [0], [1], [0, 0, 1, 1], [], []>} : vector<2x32xf32>, vector<32x128xf32>, vector<2x128xf32> -> vector<2x128xf32>
    %144 = vector.broadcast %7 : vector<1x128xf32> to vector<2x128xf32>
    %145 = arith.addf %143, %144 : vector<2x128xf32>
    %146 = arith.index_cast %c3_i32 : i32 to index
    %c0_52 = arith.constant 0 : index
    %c0_53 = arith.constant 0 : index
    %147 = vector.load %arg9[%146, %c0_52, %c0_53] : memref<8x2x128xf32, #tpu.memory_space<vmem>>, vector<1x2x128xf32>
    %148 = vector.shape_cast %147 : vector<1x2x128xf32> to vector<2x128xf32>
    %149 = vector.shape_cast %145 : vector<2x128xf32> to vector<1x2x128xf32>
    tpu.vector_store %arg9[%146, %c0_52, %c0_53], %149 {strides = array<i32>} : memref<8x2x128xf32, #tpu.memory_space<vmem>>, vector<1x2x128xf32>,
    %c4_i32 = arith.constant 4 : i32
    %150 = arith.index_cast %c4_i32 : i32 to index
    %c0_54 = arith.constant 0 : index
    %c0_55 = arith.constant 0 : index
    %151 = vector.load %arg1[%150, %c0_54, %c0_55] : memref<8x2x4xf32, #tpu.memory_space<vmem>>, vector<1x2x4xf32>
    %152 = vector.shape_cast %151 : vector<1x2x4xf32> to vector<2x4xf32>
    %cst_56 = arith.constant dense<0.000000e+00> : vector<2x128xf32>
    %153 = tpu.matmul %152, %3, %cst_56 {dimension_numbers = #tpu.dot_dimension_numbers<[1], [0], [0], [1], [0, 0, 1, 1], [], []>} : vector<2x4xf32>, vector<4x128xf32>, vector<2x128xf32> -> vector<2x128xf32>
    %cst_57 = arith.constant dense<0.000000e+00> : vector<2x128xf32>
    %154 = tpu.matmul %137, %4, %cst_57 {dimension_numbers = #tpu.dot_dimension_numbers<[1], [0], [0], [1], [0, 0, 1, 1], [], []>} : vector<2x32xf32>, vector<32x128xf32>, vector<2x128xf32> -> vector<2x128xf32>
    %155 = arith.addf %153, %154 : vector<2x128xf32>
    %156 = vector.broadcast %5 : vector<1x128xf32> to vector<2x128xf32>
    %157 = arith.addf %155, %156 : vector<2x128xf32>
    %158 = arith.negf %157 : vector<2x128xf32>
    %159 = math.exp %158 : vector<2x128xf32>
    %cst_58 = arith.constant 1.000000e+00 : f32
    %160 = vector.broadcast %cst_58 : f32 to vector<2x128xf32>
    %161 = arith.addf %160, %159 : vector<2x128xf32>
    %162 = arith.divf %160, %161 : vector<2x128xf32>
    %163 = math.tanh %157 : vector<2x128xf32>
    %164 = vector.extract_strided_slice %162 {offsets = [0, 0], sizes = [2, 32], strides = [1, 1]} : vector<2x128xf32> to vector<2x32xf32>
    %165 = vector.extract_strided_slice %162 {offsets = [0, 32], sizes = [2, 32], strides = [1, 1]} : vector<2x128xf32> to vector<2x32xf32>
    %166 = vector.extract_strided_slice %163 {offsets = [0, 64], sizes = [2, 32], strides = [1, 1]} : vector<2x128xf32> to vector<2x32xf32>
    %167 = vector.extract_strided_slice %162 {offsets = [0, 96], sizes = [2, 32], strides = [1, 1]} : vector<2x128xf32> to vector<2x32xf32>
    %168 = arith.mulf %165, %135 : vector<2x32xf32>
    %169 = arith.mulf %164, %166 : vector<2x32xf32>
    %170 = arith.addf %168, %169 : vector<2x32xf32>
    %171 = math.tanh %170 : vector<2x32xf32>
    %172 = arith.mulf %167, %171 : vector<2x32xf32>
    %cst_59 = arith.constant 0.000000e+00 : f32
    %173 = vector.broadcast %cst_59 : f32 to vector<2x32xf32>
    %174 = arith.cmpf ogt, %172, %173 : vector<2x32xf32>
    %cst_60 = arith.constant 0.00999999977 : f32
    %175 = vector.broadcast %cst_60 : f32 to vector<2x32xf32>
    %176 = arith.mulf %175, %172 : vector<2x32xf32>
    %177 = arith.select %174, %172, %176 : vector<2x32xi1>, vector<2x32xf32>
    %cst_61 = arith.constant dense<0.000000e+00> : vector<2x128xf32>
    %178 = tpu.matmul %177, %6, %cst_61 {dimension_numbers = #tpu.dot_dimension_numbers<[1], [0], [0], [1], [0, 0, 1, 1], [], []>} : vector<2x32xf32>, vector<32x128xf32>, vector<2x128xf32> -> vector<2x128xf32>
    %179 = vector.broadcast %7 : vector<1x128xf32> to vector<2x128xf32>
    %180 = arith.addf %178, %179 : vector<2x128xf32>
    %181 = arith.index_cast %c4_i32 : i32 to index
    %c0_62 = arith.constant 0 : index
    %c0_63 = arith.constant 0 : index
    %182 = vector.load %arg9[%181, %c0_62, %c0_63] : memref<8x2x128xf32, #tpu.memory_space<vmem>>, vector<1x2x128xf32>
    %183 = vector.shape_cast %182 : vector<1x2x128xf32> to vector<2x128xf32>
    %184 = vector.shape_cast %180 : vector<2x128xf32> to vector<1x2x128xf32>
    tpu.vector_store %arg9[%181, %c0_62, %c0_63], %184 {strides = array<i32>} : memref<8x2x128xf32, #tpu.memory_space<vmem>>, vector<1x2x128xf32>,
    %c5_i32 = arith.constant 5 : i32
    %185 = arith.index_cast %c5_i32 : i32 to index
    %c0_64 = arith.constant 0 : index
    %c0_65 = arith.constant 0 : index
    %186 = vector.load %arg1[%185, %c0_64, %c0_65] : memref<8x2x4xf32, #tpu.memory_space<vmem>>, vector<1x2x4xf32>
    %187 = vector.shape_cast %186 : vector<1x2x4xf32> to vector<2x4xf32>
    %cst_66 = arith.constant dense<0.000000e+00> : vector<2x128xf32>
    %188 = tpu.matmul %187, %3, %cst_66 {dimension_numbers = #tpu.dot_dimension_numbers<[1], [0], [0], [1], [0, 0, 1, 1], [], []>} : vector<2x4xf32>, vector<4x128xf32>, vector<2x128xf32> -> vector<2x128xf32>
    %cst_67 = arith.constant dense<0.000000e+00> : vector<2x128xf32>
    %189 = tpu.matmul %172, %4, %cst_67 {dimension_numbers = #tpu.dot_dimension_numbers<[1], [0], [0], [1], [0, 0, 1, 1], [], []>} : vector<2x32xf32>, vector<32x128xf32>, vector<2x128xf32> -> vector<2x128xf32>
    %190 = arith.addf %188, %189 : vector<2x128xf32>
    %191 = vector.broadcast %5 : vector<1x128xf32> to vector<2x128xf32>
    %192 = arith.addf %190, %191 : vector<2x128xf32>
    %193 = arith.negf %192 : vector<2x128xf32>
    %194 = math.exp %193 : vector<2x128xf32>
    %cst_68 = arith.constant 1.000000e+00 : f32
    %195 = vector.broadcast %cst_68 : f32 to vector<2x128xf32>
    %196 = arith.addf %195, %194 : vector<2x128xf32>
    %197 = arith.divf %195, %196 : vector<2x128xf32>
    %198 = math.tanh %192 : vector<2x128xf32>
    %199 = vector.extract_strided_slice %197 {offsets = [0, 0], sizes = [2, 32], strides = [1, 1]} : vector<2x128xf32> to vector<2x32xf32>
    %200 = vector.extract_strided_slice %197 {offsets = [0, 32], sizes = [2, 32], strides = [1, 1]} : vector<2x128xf32> to vector<2x32xf32>
    %201 = vector.extract_strided_slice %198 {offsets = [0, 64], sizes = [2, 32], strides = [1, 1]} : vector<2x128xf32> to vector<2x32xf32>
    %202 = vector.extract_strided_slice %197 {offsets = [0, 96], sizes = [2, 32], strides = [1, 1]} : vector<2x128xf32> to vector<2x32xf32>
    %203 = arith.mulf %200, %170 : vector<2x32xf32>
    %204 = arith.mulf %199, %201 : vector<2x32xf32>
    %205 = arith.addf %203, %204 : vector<2x32xf32>
    %206 = math.tanh %205 : vector<2x32xf32>
    %207 = arith.mulf %202, %206 : vector<2x32xf32>
    %cst_69 = arith.constant 0.000000e+00 : f32
    %208 = vector.broadcast %cst_69 : f32 to vector<2x32xf32>
    %209 = arith.cmpf ogt, %207, %208 : vector<2x32xf32>
    %cst_70 = arith.constant 0.00999999977 : f32
    %210 = vector.broadcast %cst_70 : f32 to vector<2x32xf32>
    %211 = arith.mulf %210, %207 : vector<2x32xf32>
    %212 = arith.select %209, %207, %211 : vector<2x32xi1>, vector<2x32xf32>
    %cst_71 = arith.constant dense<0.000000e+00> : vector<2x128xf32>
    %213 = tpu.matmul %212, %6, %cst_71 {dimension_numbers = #tpu.dot_dimension_numbers<[1], [0], [0], [1], [0, 0, 1, 1], [], []>} : vector<2x32xf32>, vector<32x128xf32>, vector<2x128xf32> -> vector<2x128xf32>
    %214 = vector.broadcast %7 : vector<1x128xf32> to vector<2x128xf32>
    %215 = arith.addf %213, %214 : vector<2x128xf32>
    %216 = arith.index_cast %c5_i32 : i32 to index
    %c0_72 = arith.constant 0 : index
    %c0_73 = arith.constant 0 : index
    %217 = vector.load %arg9[%216, %c0_72, %c0_73] : memref<8x2x128xf32, #tpu.memory_space<vmem>>, vector<1x2x128xf32>
    %218 = vector.shape_cast %217 : vector<1x2x128xf32> to vector<2x128xf32>
    %219 = vector.shape_cast %215 : vector<2x128xf32> to vector<1x2x128xf32>
    tpu.vector_store %arg9[%216, %c0_72, %c0_73], %219 {strides = array<i32>} : memref<8x2x128xf32, #tpu.memory_space<vmem>>, vector<1x2x128xf32>,
    %c6_i32 = arith.constant 6 : i32
    %220 = arith.index_cast %c6_i32 : i32 to index
    %c0_74 = arith.constant 0 : index
    %c0_75 = arith.constant 0 : index
    %221 = vector.load %arg1[%220, %c0_74, %c0_75] : memref<8x2x4xf32, #tpu.memory_space<vmem>>, vector<1x2x4xf32>
    %222 = vector.shape_cast %221 : vector<1x2x4xf32> to vector<2x4xf32>
    %cst_76 = arith.constant dense<0.000000e+00> : vector<2x128xf32>
    %223 = tpu.matmul %222, %3, %cst_76 {dimension_numbers = #tpu.dot_dimension_numbers<[1], [0], [0], [1], [0, 0, 1, 1], [], []>} : vector<2x4xf32>, vector<4x128xf32>, vector<2x128xf32> -> vector<2x128xf32>
    %cst_77 = arith.constant dense<0.000000e+00> : vector<2x128xf32>
    %224 = tpu.matmul %207, %4, %cst_77 {dimension_numbers = #tpu.dot_dimension_numbers<[1], [0], [0], [1], [0, 0, 1, 1], [], []>} : vector<2x32xf32>, vector<32x128xf32>, vector<2x128xf32> -> vector<2x128xf32>
    %225 = arith.addf %223, %224 : vector<2x128xf32>
    %226 = vector.broadcast %5 : vector<1x128xf32> to vector<2x128xf32>
    %227 = arith.addf %225, %226 : vector<2x128xf32>
    %228 = arith.negf %227 : vector<2x128xf32>
    %229 = math.exp %228 : vector<2x128xf32>
    %cst_78 = arith.constant 1.000000e+00 : f32
    %230 = vector.broadcast %cst_78 : f32 to vector<2x128xf32>
    %231 = arith.addf %230, %229 : vector<2x128xf32>
    %232 = arith.divf %230, %231 : vector<2x128xf32>
    %233 = math.tanh %227 : vector<2x128xf32>
    %234 = vector.extract_strided_slice %232 {offsets = [0, 0], sizes = [2, 32], strides = [1, 1]} : vector<2x128xf32> to vector<2x32xf32>
    %235 = vector.extract_strided_slice %232 {offsets = [0, 32], sizes = [2, 32], strides = [1, 1]} : vector<2x128xf32> to vector<2x32xf32>
    %236 = vector.extract_strided_slice %233 {offsets = [0, 64], sizes = [2, 32], strides = [1, 1]} : vector<2x128xf32> to vector<2x32xf32>
    %237 = vector.extract_strided_slice %232 {offsets = [0, 96], sizes = [2, 32], strides = [1, 1]} : vector<2x128xf32> to vector<2x32xf32>
    %238 = arith.mulf %235, %205 : vector<2x32xf32>
    %239 = arith.mulf %234, %236 : vector<2x32xf32>
    %240 = arith.addf %238, %239 : vector<2x32xf32>
    %241 = math.tanh %240 : vector<2x32xf32>
    %242 = arith.mulf %237, %241 : vector<2x32xf32>
    %cst_79 = arith.constant 0.000000e+00 : f32
    %243 = vector.broadcast %cst_79 : f32 to vector<2x32xf32>
    %244 = arith.cmpf ogt, %242, %243 : vector<2x32xf32>
    %cst_80 = arith.constant 0.00999999977 : f32
    %245 = vector.broadcast %cst_80 : f32 to vector<2x32xf32>
    %246 = arith.mulf %245, %242 : vector<2x32xf32>
    %247 = arith.select %244, %242, %246 : vector<2x32xi1>, vector<2x32xf32>
    %cst_81 = arith.constant dense<0.000000e+00> : vector<2x128xf32>
    %248 = tpu.matmul %247, %6, %cst_81 {dimension_numbers = #tpu.dot_dimension_numbers<[1], [0], [0], [1], [0, 0, 1, 1], [], []>} : vector<2x32xf32>, vector<32x128xf32>, vector<2x128xf32> -> vector<2x128xf32>
    %249 = vector.broadcast %7 : vector<1x128xf32> to vector<2x128xf32>
    %250 = arith.addf %248, %249 : vector<2x128xf32>
    %251 = arith.index_cast %c6_i32 : i32 to index
    %c0_82 = arith.constant 0 : index
    %c0_83 = arith.constant 0 : index
    %252 = vector.load %arg9[%251, %c0_82, %c0_83] : memref<8x2x128xf32, #tpu.memory_space<vmem>>, vector<1x2x128xf32>
    %253 = vector.shape_cast %252 : vector<1x2x128xf32> to vector<2x128xf32>
    %254 = vector.shape_cast %250 : vector<2x128xf32> to vector<1x2x128xf32>
    tpu.vector_store %arg9[%251, %c0_82, %c0_83], %254 {strides = array<i32>} : memref<8x2x128xf32, #tpu.memory_space<vmem>>, vector<1x2x128xf32>,
    %c7_i32 = arith.constant 7 : i32
    %255 = arith.index_cast %c7_i32 : i32 to index
    %c0_84 = arith.constant 0 : index
    %c0_85 = arith.constant 0 : index
    %256 = vector.load %arg1[%255, %c0_84, %c0_85] : memref<8x2x4xf32, #tpu.memory_space<vmem>>, vector<1x2x4xf32>
    %257 = vector.shape_cast %256 : vector<1x2x4xf32> to vector<2x4xf32>
    %cst_86 = arith.constant dense<0.000000e+00> : vector<2x128xf32>
    %258 = tpu.matmul %257, %3, %cst_86 {dimension_numbers = #tpu.dot_dimension_numbers<[1], [0], [0], [1], [0, 0, 1, 1], [], []>} : vector<2x4xf32>, vector<4x128xf32>, vector<2x128xf32> -> vector<2x128xf32>
    %cst_87 = arith.constant dense<0.000000e+00> : vector<2x128xf32>
    %259 = tpu.matmul %242, %4, %cst_87 {dimension_numbers = #tpu.dot_dimension_numbers<[1], [0], [0], [1], [0, 0, 1, 1], [], []>} : vector<2x32xf32>, vector<32x128xf32>, vector<2x128xf32> -> vector<2x128xf32>
    %260 = arith.addf %258, %259 : vector<2x128xf32>
    %261 = vector.broadcast %5 : vector<1x128xf32> to vector<2x128xf32>
    %262 = arith.addf %260, %261 : vector<2x128xf32>
    %263 = arith.negf %262 : vector<2x128xf32>
    %264 = math.exp %263 : vector<2x128xf32>
    %cst_88 = arith.constant 1.000000e+00 : f32
    %265 = vector.broadcast %cst_88 : f32 to vector<2x128xf32>
    %266 = arith.addf %265, %264 : vector<2x128xf32>
    %267 = arith.divf %265, %266 : vector<2x128xf32>
    %268 = math.tanh %262 : vector<2x128xf32>
    %269 = vector.extract_strided_slice %267 {offsets = [0, 0], sizes = [2, 32], strides = [1, 1]} : vector<2x128xf32> to vector<2x32xf32>
    %270 = vector.extract_strided_slice %267 {offsets = [0, 32], sizes = [2, 32], strides = [1, 1]} : vector<2x128xf32> to vector<2x32xf32>
    %271 = vector.extract_strided_slice %268 {offsets = [0, 64], sizes = [2, 32], strides = [1, 1]} : vector<2x128xf32> to vector<2x32xf32>
    %272 = vector.extract_strided_slice %267 {offsets = [0, 96], sizes = [2, 32], strides = [1, 1]} : vector<2x128xf32> to vector<2x32xf32>
    %273 = arith.mulf %270, %240 : vector<2x32xf32>
    %274 = arith.mulf %269, %271 : vector<2x32xf32>
    %275 = arith.addf %273, %274 : vector<2x32xf32>
    %276 = math.tanh %275 : vector<2x32xf32>
    %277 = arith.mulf %272, %276 : vector<2x32xf32>
    %cst_89 = arith.constant 0.000000e+00 : f32
    %278 = vector.broadcast %cst_89 : f32 to vector<2x32xf32>
    %279 = arith.cmpf ogt, %277, %278 : vector<2x32xf32>
    %cst_90 = arith.constant 0.00999999977 : f32
    %280 = vector.broadcast %cst_90 : f32 to vector<2x32xf32>
    %281 = arith.mulf %280, %277 : vector<2x32xf32>
    %282 = arith.select %279, %277, %281 : vector<2x32xi1>, vector<2x32xf32>
    %cst_91 = arith.constant dense<0.000000e+00> : vector<2x128xf32>
    %283 = tpu.matmul %282, %6, %cst_91 {dimension_numbers = #tpu.dot_dimension_numbers<[1], [0], [0], [1], [0, 0, 1, 1], [], []>} : vector<2x32xf32>, vector<32x128xf32>, vector<2x128xf32> -> vector<2x128xf32>
    %284 = vector.broadcast %7 : vector<1x128xf32> to vector<2x128xf32>
    %285 = arith.addf %283, %284 : vector<2x128xf32>
    %286 = arith.index_cast %c7_i32 : i32 to index
    %c0_92 = arith.constant 0 : index
    %c0_93 = arith.constant 0 : index
    %287 = vector.load %arg9[%286, %c0_92, %c0_93] : memref<8x2x128xf32, #tpu.memory_space<vmem>>, vector<1x2x128xf32>
    %288 = vector.shape_cast %287 : vector<1x2x128xf32> to vector<2x128xf32>
    %289 = vector.shape_cast %285 : vector<2x128xf32> to vector<1x2x128xf32>
    tpu.vector_store %arg9[%286, %c0_92, %c0_93], %289 {strides = array<i32>} : memref<8x2x128xf32, #tpu.memory_space<vmem>>, vector<1x2x128xf32>,
    %c8_i32 = arith.constant 8 : i32
    %c0_94 = arith.constant 0 : index
    %c0_95 = arith.constant 0 : index
    %290 = vector.load %arg12[%c0_94, %c0_95] : memref<2x32xf32, #tpu.memory_space<vmem>>, vector<2x32xf32>
    tpu.vector_store %arg12[%c0_94, %c0_95], %277 {strides = array<i32>} : memref<2x32xf32, #tpu.memory_space<vmem>>, vector<2x32xf32>,
    %c0_96 = arith.constant 0 : index
    %c0_97 = arith.constant 0 : index
    %291 = vector.load %arg13[%c0_96, %c0_97] : memref<2x32xf32, #tpu.memory_space<vmem>>, vector<2x32xf32>
    tpu.vector_store %arg13[%c0_96, %c0_97], %275 {strides = array<i32>} : memref<2x32xf32, #tpu.memory_space<vmem>>, vector<2x32xf32>,
    %c0_i32_98 = arith.constant 0 : i32
    %292 = arith.cmpi eq, %arg0, %c0_i32_98 : i32
    %293 = arith.extui %292 : i1 to i32
    %c0_i32_99 = arith.constant 0 : i32
    %294 = arith.cmpi ne, %293, %c0_i32_99 : i32
    scf.if %294 {
      %c0_100 = arith.constant 0 : index
      %c0_101 = arith.constant 0 : index
      %295 = vector.load %arg12[%c0_100, %c0_101] : memref<2x32xf32, #tpu.memory_space<vmem>>, vector<2x32xf32>
      %c0_102 = arith.constant 0 : index
      %c0_103 = arith.constant 0 : index
      %296 = vector.load %arg10[%c0_102, %c0_103] : memref<2x32xf32, #tpu.memory_space<vmem>>, vector<2x32xf32>
      tpu.vector_store %arg10[%c0_102, %c0_103], %295 {strides = array<i32>} : memref<2x32xf32, #tpu.memory_space<vmem>>, vector<2x32xf32>,
      %c0_104 = arith.constant 0 : index
      %c0_105 = arith.constant 0 : index
      %297 = vector.load %arg13[%c0_104, %c0_105] : memref<2x32xf32, #tpu.memory_space<vmem>>, vector<2x32xf32>
      %c0_106 = arith.constant 0 : index
      %c0_107 = arith.constant 0 : index
      %298 = vector.load %arg11[%c0_106, %c0_107] : memref<2x32xf32, #tpu.memory_space<vmem>>, vector<2x32xf32>
      tpu.vector_store %arg11[%c0_106, %c0_107], %297 {strides = array<i32>} : memref<2x32xf32, #tpu.memory_space<vmem>>, vector<2x32xf32>,
    } else {
    }
    return
  }
  func.func @transform_0(%arg0: i32) -> (i32, i32, i32) {
    %c0_i32 = arith.constant 0 : i32
    %c0_i32_0 = arith.constant 0 : i32
    %c0_i32_1 = arith.constant 0 : i32
    return %arg0, %c0_i32, %c0_i32_0 : i32, i32, i32
  }
  func.func @transform_1(%arg0: i32) -> (i32, i32) {
    %c0_i32 = arith.constant 0 : i32
    %c0_i32_0 = arith.constant 0 : i32
    %c0_i32_1 = arith.constant 0 : i32
    return %c0_i32, %c0_i32_0 : i32, i32
  }
  func.func @transform_2(%arg0: i32) -> (i32, i32) {
    %c0_i32 = arith.constant 0 : i32
    %c0_i32_0 = arith.constant 0 : i32
    %c0_i32_1 = arith.constant 0 : i32
    return %c0_i32, %c0_i32_0 : i32, i32
  }
  func.func @transform_3(%arg0: i32) -> (i32, i32) {
    %c0_i32 = arith.constant 0 : i32
    %c0_i32_0 = arith.constant 0 : i32
    %c0_i32_1 = arith.constant 0 : i32
    return %c0_i32, %c0_i32_0 : i32, i32
  }
  func.func @transform_4(%arg0: i32) -> (i32, i32) {
    %c0_i32 = arith.constant 0 : i32
    %c0_i32_0 = arith.constant 0 : i32
    %c0_i32_1 = arith.constant 0 : i32
    return %c0_i32, %c0_i32_0 : i32, i32
  }
  func.func @transform_5(%arg0: i32) -> (i32, i32) {
    %c0_i32 = arith.constant 0 : i32
    %c0_i32_0 = arith.constant 0 : i32
    %c0_i32_1 = arith.constant 0 : i32
    return %c0_i32, %c0_i32_0 : i32, i32
  }
  func.func @transform_6(%arg0: i32) -> (i32, i32) {
    %c0_i32 = arith.constant 0 : i32
    %c0_i32_0 = arith.constant 0 : i32
    %c0_i32_1 = arith.constant 0 : i32
    return %c0_i32, %c0_i32_0 : i32, i32
  }
  func.func @transform_7(%arg0: i32) -> (i32, i32) {
    %c0_i32 = arith.constant 0 : i32
    %c0_i32_0 = arith.constant 0 : i32
    %c0_i32_1 = arith.constant 0 : i32
    return %c0_i32, %c0_i32_0 : i32, i32
  }
  func.func @transform_8(%arg0: i32) -> (i32, i32, i32) {
    %c0_i32 = arith.constant 0 : i32
    %c0_i32_0 = arith.constant 0 : i32
    %c0_i32_1 = arith.constant 0 : i32
    return %arg0, %c0_i32, %c0_i32_0 : i32, i32, i32
  }
  func.func @transform_9(%arg0: i32) -> (i32, i32) {
    %c0_i32 = arith.constant 0 : i32
    %c0_i32_0 = arith.constant 0 : i32
    %c0_i32_1 = arith.constant 0 : i32
    return %c0_i32, %c0_i32_0 : i32, i32
  }
  func.func @transform_10(%arg0: i32) -> (i32, i32) {
    %c0_i32 = arith.constant 0 : i32
    %c0_i32_0 = arith.constant 0 : i32
    %c0_i32_1 = arith.constant 0 : i32
    return %c0_i32, %c0_i32_0 : i32, i32
  }
}

</mosaic_0001>

<bundles_post_ra>
// kernel: tpu_custom_call.1
= control target key start
LH: loop header
LB: loop body
LE: loop exit
PB: predicated region body
PF: predicated region fallthrough
CT: control target
= control target key end

     0   :  { %16 = vsyncpa [#allocation5], 0  ;;  %s1680_s0 = inlined_call_operand.vmem [shape: f32[8,2,4], index: 0, kind: input, shape index: {}]   ;;  %s1681_s1 = inlined_call_operand.vmem [shape: f32[2,32], index: 1, kind: input, shape index: {}]   ;;  %s1682_s2 = inlined_call_operand.vmem [shape: f32[2,32], index: 2, kind: input, shape index: {}]   ;;  %s1683_s3 = inlined_call_operand.vmem [shape: f32[4,128], index: 3, kind: input, shape index: {}]   ;;  %s1684_s4 = inlined_call_operand.hbm [shape: f32[32,128], index: 4, kind: input, shape index: {}]   ;;  %s1685_s5 = inlined_call_operand.vmem [shape: f32[1,128], index: 5, kind: input, shape index: {}]   ;;  %s1686_s6 = inlined_call_operand.hbm [shape: f32[32,128], index: 6, kind: input, shape index: {}]   ;;  %s1687_s7 = inlined_call_operand.vmem [shape: f32[1,128], index: 7, kind: input, shape index: {}]   ;;  %s1688_s8 = inlined_call_operand.hbm [shape: f32[8,2,128], index: 8, kind: output, shape index: {0}]   ;;  %s1689_s9 = inlined_call_operand.hbm [shape: f32[2,32], index: 9, kind: output, shape index: {1}]   ;;  %s1690_s10 = inlined_call_operand.hbm [shape: f32[2,32], index: 10, kind: output, shape index: {2}]  }
   0x1   :  { %17 = vsyncpa [#allocation8], 0 }
   0x2   :  { %18 = vsyncpa [#allocation6], 0 }
   0x3   :  { %19 = vsyncpa [#allocation11], 0  ;;  %s32_s15 = sshll.u32 %s1684_s4, 4  ;;  %s1365_s16 = smov [#allocation4]   ;;  %s33_s15 = int_to_ptr.hbm [resolvable:$true] %s32_s15 }
   0x4   :  { %s34_s17 = sshll.u32 %s1365_s16, 4  ;;  %s47_s20 = sshll.u32 %s1686_s6, 4  ;;  %s35_s17 = int_to_ptr.vmem [resolvable:$true] %s34_s17  ;;  %s48_s20 = int_to_ptr.hbm [resolvable:$true] %s47_s20 }
   0x5   :  { %s1366_s21 = smov 128   ;;  %s1367_s22 = smov 8  }
   0x6   :  { %40 = dma.hbm_to_vmem [thread:$0]  %s33_s15, 512, %s35_s17, [#allocation5], %s1366_s21, %s1366_s21, %s1367_s22  }
   0x7   :  { %s1368_s23 = smov [#allocation7]  }
   0x8   :  { %s49_s24 = sshll.u32 %s1368_s23, 4  ;;  %s50_s24 = int_to_ptr.vmem [resolvable:$true] %s49_s24 }
   0x9   :  { %55 = dma.hbm_to_vmem [thread:$0]  %s48_s20, 512, %s50_s24, [#allocation8], %s1366_s21, %s1366_s21, %s1367_s22  }
   0xa   :  { %1357 = dma.done.wait [#allocation5], 512  }
   0xb   :  { %1358 = vsyncadd [#allocation5], 4294966784 }
   0xc   :  { %1359 = dma.done.wait [#allocation8], 512  }
   0xd   :  { %1360 = vsyncadd [#allocation8], 4294966784  ;;  %vm117_vm0 = vcmask 1043456   ;;  %vm71_vm1 = vcmask 254976   ;;  %v1437_v0 = vld [vmem:[#allocation4 + $0x18] sm:$0xff]  ;;  %v1439_v1 = vld [vmem:[#allocation4 + $0x10] sm:$0xff] }
   0xe   :  { %vm113_vm2 = vcmask 31744   ;;  %105 = vmatpush.msra.mxu0 %v1437_v0  ;;  %v1442_v2 = vld [vmem:[#allocation4 + $0x8] sm:$0xff]  ;;  %v1447_v3 = vld [vmem:[%s1683_s3] sm:$0xf]  ;;  %237 = vmatpush.msra.mxu3 %v1437_v0  ;;  %v1461_v6 = vld [vmem:[#allocation4] sm:$0xff]  ;;  %vm89_vm3 = vcmask 261120  }
   0xf   :  { %v70_v4 = vld [vmem:[%s1681_s1] sm:$0x3]  ;;  %1114 = vmatpush.msk.msra.mxu1 %vm117_vm0, %v1447_v3  ;;  %s1369_s11 = smov 64   ;;  %s1370_s12 = smov 32   ;;  %v1118_v38 = vld [vmem:[%s1680_s0 + $0x2] sm:$0x3] }
  0x10   :  { %72 = vst.msk [vmem:[#allocation2] sm:$0x3] %vm71_vm1, %v70_v4  ;;  %v88_v5 = vld [vmem:[%s1680_s0] sm:$0x3]  ;;  %106 = vmatpush.msra.mxu0 %v1439_v1  ;;  %238 = vmatpush.msra.mxu3 %v1439_v1  ;;  %v1503_v51 = vld [vmem:[#allocation7 + $0x10] sm:$0xff]  ;;  %v1505_v52 = vld [vmem:[#allocation7 + $0x8] sm:$0xff] }
  0x11   :  { %1115 = vmatmul.msk.f32.vlgmr.msra.gmra.mxu1 %vm113_vm2, %v88_v5  ;;  %v73_v8 = vld [vmem:[%s1682_s2] sm:$0x3]  ;;  %v1511_v53 = vld [vmem:[#allocation7] sm:$0xff]  ;;  %s1372_s6 = smov [#allocation10]   ;;  %s1082_s28 = sshll.u32 %s1689_s9, 4  ;;  %s1083_s28 = int_to_ptr.hbm [resolvable:$true] %s1082_s28 }
  0x12   :  { %1120 = vmatpush.msk.msrb.mxu1 %vm117_vm0, %v1447_v3  ;;  %107 = vmatpush.msra.mxu0 %v1442_v2  ;;  %74 = vst.msk [vmem:[#allocation3] sm:$0x3] %vm71_vm1, %v73_v8  ;;  %v1480_v10 = vld [vmem:[%s1685_s5] ss:$0 sm:$0xff]  ;;  %s1080_s25 = sshll.u32 %s1372_s6, 4  ;;  %s1373_s1 = smov [#allocation12]   ;;  %s1081_s25 = int_to_ptr.vmem [resolvable:$true] %s1080_s25 }
  0x13   :  { %239 = vmatpush.msra.mxu3 %v1442_v2  ;;  %v1499_v50 = vld [vmem:[#allocation7 + $0x18] sm:$0xff]  ;;  %s1091_s3 = sshll.u32 %s1373_s1, 4  ;;  %s1068_s13 = sshll.u32 %s1688_s8, 4  ;;  %s1092_s3 = int_to_ptr.vmem [resolvable:$true] %s1091_s3  ;;  %s1069_s13 = int_to_ptr.hbm [resolvable:$true] %s1068_s13 }
  0x14   :  { %108 = vmatpush.msra.mxu0 %v1461_v6  ;;  %209 = vmatpush.msra.mxu2 %v1499_v50  ;;  %s1374_s9 = smov [#allocation9]  }
  0x15   :  { %240 = vmatpush.msra.mxu3 %v1461_v6  ;;  %444 = vmatpush.msra.mxu1 %v1499_v50  ;;  %s1066_s14 = sshll.u32 %s1374_s9, 4  ;;  %s1067_s14 = int_to_ptr.vmem [resolvable:$true] %s1066_s14 }
  0x16   :  { %326 = vmatpush.msrb.mxu0 %v1499_v50  ;;  %210 = vmatpush.msra.mxu2 %v1503_v51 }
  0x17   :  { %v86_v7 = vld [vmem:[#allocation2] sm:$0x3]  ;;  %1126 = vmatpush.msk.msrb.mxu3 %vm117_vm0, %v1447_v3  ;;  %445 = vmatpush.msra.mxu1 %v1503_v51 }
  0x18   :  { %1113 = vmatmul.msk.f32.vlgmr.msra.gmra.mxu0 %vm89_vm3, %v86_v7  ;;  %211 = vmatpush.msra.mxu2 %v1505_v52 }
  0x19   :  { %v87_v15 = vld [vmem:[#allocation3] sm:$0x3]  ;;  %1121 = vmatmul.msk.f32.vlgmr.msrb.gmra.mxu1 %vm113_vm2, %v1118_v38  ;;  %327 = vmatpush.msrb.mxu0 %v1503_v51 }
  0x1a   :  { %446 = vmatpush.msra.mxu1 %v1505_v52  ;;  %212 = vmatpush.msra.mxu2 %v1511_v53 }
  0x1b   :  { %328 = vmatpush.msrb.mxu0 %v1505_v52 }
  0x1c   :  { %355 = vmatpush.msrb.mxu2 %v1437_v0  ;;  %447 = vmatpush.msra.mxu1 %v1511_v53 }
  0x1d   :  { %329 = vmatpush.msrb.mxu0 %v1511_v53 }
  0x1e   :  { %356 = vmatpush.msrb.mxu2 %v1439_v1  ;;  %591 = vmatpush.msrb.mxu1 %v1437_v0 }
  0x1f   :  { %473 = vmatpush.msra.mxu0 %v1437_v0 }
  0x20   :  { %357 = vmatpush.msrb.mxu2 %v1442_v2  ;;  %592 = vmatpush.msrb.mxu1 %v1439_v1 }
  0x21   :  { %474 = vmatpush.msra.mxu0 %v1439_v1 }
  0x22   :  { %358 = vmatpush.msrb.mxu2 %v1461_v6  ;;  %593 = vmatpush.msrb.mxu1 %v1442_v2 }
  0x23   :  { %475 = vmatpush.msra.mxu0 %v1442_v2 }
  0x24   :  { %594 = vmatpush.msrb.mxu1 %v1461_v6 }
  0x25   :  { %476 = vmatpush.msra.mxu0 %v1461_v6 }
  0x8e   :  { %v138_v9 = vpop.f32.mrf.mxu1 }
  0x95   :  { %v110_v11 = vpop.f32.mrf.mxu0 }
  0x96   :  { %v139_v12 = vadd.f32 %v138_v9, %v110_v11  ;;  %v265_v40 = vpop.f32.mrf.mxu1 }
  0x98   :  { %v144_v13 = vadd.f32 %v1480_v10, %v139_v12 }
  0x9a   :  { %1173 = vtanh.f32 %v144_v13  ;;  %v1116_v16 = vmul.f32 -1.442695, %v144_v13  ;;  %v1544_v13 = vld [vmem:[%s1687_s7] ss:$0 sm:$0xff] }
  0x9c   :  { %1175 = vpow2.f32 %v1116_v16 }
  0xa0   :  { %v1174_v14 = vpop.eup %1173 }
  0xa1   :  { %171 = vrot.lane.b32.xlu0 %v1174_v14, %s1369_s11 }
  0xa2   :  { %v1176_v17 = vpop.eup %1175 }
  0xa3   :  { %v148_v18 = vadd.f32 1.0, %v1176_v17 }
  0xa5   :  { %1177 = vrcp.f32 %v148_v18  ;;  %v160_v24 = vand.u32 2147483648, %v148_v18  ;;  %vm154_vm5 = vweird.f32 %v148_v18  ;;  %v158_v25 = vand.u32 2147483647, %v148_v18 }
  0xa7   :  { %v161_v27 = vor.u32 1.1754944e-38, %v160_v24  ;;  %vm159_vm7 = vcmp.eq.f32.partialorder %v158_v25, 8.507059e+37 }
  0xa9   :  { %166 = vrot.lane.b32.xlu0 %v87_v15, %s1370_s12 }
  0xab   :  { %v1178_v19 = vpop.eup %1177 }
  0xac   :  { %v150_v20 = vmul.f32 %v1178_v19, %v148_v18  ;;  %vm155_vm4 = vweird.f32 %v1178_v19  ;;  %v1124_v18 = vld [vmem:[%s1680_s0 + $0x4] sm:$0x3] }
  0xad   :  { %vm156_vm6 = vmor %vm154_vm5, %vm155_vm4 }
  0xae   :  { %v151_v21 = vsub.f32 1.0, %v150_v20 }
  0xb0   :  { %v152_v22 = vmul.f32 %v1178_v19, %v151_v21 }
  0xb2   :  { %v153_v23 = vadd.f32 %v1178_v19, %v152_v22 }
  0xb4   :  { %v157_v26 = vsel %vm156_vm6, %v1178_v19, %v153_v23 }
  0xb5   :  { %v162_v29 = vsel %vm159_vm7, %v161_v27, %v157_v26 }
 0x113   :  { %v172_v28 = vpop.permute.xlu0 %171 }
 0x114   :  { %v174_v30 = vmul.f32 %v172_v28, %v162_v29 }
 0x116   :  { %176 = vrot.lane.b32.xlu1 %v174_v30, %s1370_s12 }
 0x11b   :  { %v167_v31 = vpop.permute.xlu0 %166 }
 0x11c   :  { %v169_v32 = vmul.f32 %v167_v31, %v162_v29 }
 0x188   :  { %v177_v33 = vpop.permute.xlu1 %176 }
 0x189   :  { %v1486_v34 = vadd.f32 %v177_v33, %v169_v32 }
 0x18b   :  { %1179 = vtanh.f32 %v1486_v34 }
 0x191   :  { %v1180_v35 = vpop.eup %1179 }
 0x192   :  { %182 = vrot.lane.b32.xlu1 %v1180_v35, %s1369_s11 }
 0x204   :  { %v183_v36 = vpop.permute.xlu1 %182 }
 0x205   :  { %v185_v37 = vmul.f32 %v183_v36, %v162_v29 }
 0x207   :  { %221 = vrot.lane.b32.xlu2 %v185_v37, %s1370_s12  ;;  %v187_v45 = vmul.f32 0.01, %v185_v37  ;;  %vm186_vm8 = vcmp.gt.f32.partialorder %v185_v37, 0.0 }
 0x209   :  { %v188_v46 = vsel %vm186_vm8, %v185_v37, %v187_v45 }
 0x261   :  { %v222_v39 = vpop.permute.xlu2 %221 }
 0x262   :  { %1119 = vmatmul.msk.f32.vlgmr.msra.gmra.mxu3 %vm89_vm3, %v222_v39 }
 0x263   :  { %562 = vmatpush.msra.mxu3 %v1499_v50 }
 0x265   :  { %563 = vmatpush.msra.mxu3 %v1503_v51 }
 0x267   :  { %564 = vmatpush.msra.mxu3 %v1505_v52 }
 0x269   :  { %565 = vmatpush.msra.mxu3 %v1511_v53 }
 0x26a   :  { %1127 = vmatmul.msk.f32.vlgmr.msrb.gmra.mxu3 %vm113_vm2, %v1124_v18 }
 0x26b   :  { %709 = vmatpush.msrb.mxu3 %v1437_v0 }
 0x26d   :  { %710 = vmatpush.msrb.mxu3 %v1439_v1 }
 0x26f   :  { %711 = vmatpush.msrb.mxu3 %v1442_v2 }
 0x271   :  { %712 = vmatpush.msrb.mxu3 %v1461_v6 }
 0x2e5   :  { %v242_v41 = vpop.f32.mrf.mxu3 }
 0x2e6   :  { %v266_v42 = vadd.f32 %v265_v40, %v242_v41 }
 0x2e8   :  { %v268_v43 = vadd.f32 %v1480_v10, %v266_v42 }
 0x2ea   :  { %1181 = vtanh.f32 %v268_v43  ;;  %v1122_v47 = vmul.f32 -1.442695, %v268_v43 }
 0x2ec   :  { %1183 = vpow2.f32 %v1122_v47 }
 0x2ed   :  { %v383_v20 = vpop.f32.mrf.mxu3 }
 0x2f0   :  { %v1182_v44 = vpop.eup %1181 }
 0x2f1   :  { %291 = vrot.lane.b32.xlu2 %v1182_v44, %s1369_s11 }
 0x2f2   :  { %v1184_v48 = vpop.eup %1183 }
 0x2f3   :  { %v272_v49 = vadd.f32 1.0, %v1184_v48 }
 0x2f5   :  { %1185 = vrcp.f32 %v272_v49  ;;  %v284_v59 = vand.u32 2147483648, %v272_v49  ;;  %vm278_vm10 = vweird.f32 %v272_v49  ;;  %v282_v60 = vand.u32 2147483647, %v272_v49 }
 0x2f7   :  { %v285_v62 = vor.u32 1.1754944e-38, %v284_v59  ;;  %vm283_vm12 = vcmp.eq.f32.partialorder %v282_v60, 8.507059e+37 }
 0x2f9   :  { %193 = vrot.lane.b32.xlu2 %v188_v46, %s1370_s12 }
 0x2fb   :  { %v1186_v54 = vpop.eup %1185 }
 0x2fc   :  { %v274_v55 = vmul.f32 %v1186_v54, %v272_v49  ;;  %vm279_vm9 = vweird.f32 %v1186_v54  ;;  %v1130_v49 = vld [vmem:[%s1680_s0 + $0x6] sm:$0x3] }
 0x2fd   :  { %vm280_vm11 = vmor %vm278_vm10, %vm279_vm9 }
 0x2fe   :  { %v275_v56 = vsub.f32 1.0, %v274_v55 }
 0x300   :  { %v276_v57 = vmul.f32 %v1186_v54, %v275_v56 }
 0x302   :  { %v277_v58 = vadd.f32 %v1186_v54, %v276_v57 }
 0x304   :  { %v281_v61 = vsel %vm280_vm11, %v1186_v54, %v277_v58 }
 0x305   :  { %v286_v4 = vsel %vm283_vm12, %v285_v62, %v281_v61 }
 0x306   :  { %v289_v8 = vmul.f32 %v286_v4, %v1486_v34 }
 0x34b   :  { %v292_v63 = vpop.permute.xlu2 %291 }
 0x34c   :  { %v294_v5 = vmul.f32 %v292_v63, %v286_v4 }
 0x34e   :  { %296 = vrot.lane.b32.xlu0 %v294_v5, %s1370_s12 }
 0x353   :  { %v194_v7 = vpop.permute.xlu2 %193 }
 0x354   :  { %1117 = vmatmul.msk.f32.vlgmr.msra.gmra.mxu2 %vm89_vm3, %v194_v7 }
 0x355   :  { %1132 = vmatpush.msk.msra.mxu2 %vm117_vm0, %v1447_v3 }
 0x3c0   :  { %v297_v9 = vpop.permute.xlu0 %296 }
 0x3c1   :  { %v299_v11 = vadd.f32 %v297_v9, %v289_v8 }
 0x3c3   :  { %1187 = vtanh.f32 %v299_v11 }
 0x3c9   :  { %v1188_v12 = vpop.eup %1187 }
 0x3ca   :  { %302 = vrot.lane.b32.xlu1 %v1188_v12, %s1369_s11 }
 0x3d7   :  { %v214_v14 = vpop.f32.mrf.mxu2 }
 0x3d8   :  { %v215_v15 = vadd.f32 %v1544_v13, %v214_v14 }
 0x3da   :  { %217 = vst [vmem:[#allocation9] sm:$0x3] %v215_v15 }
 0x43c   :  { %v303_v16 = vpop.permute.xlu1 %302 }
 0x43d   :  { %v305_v17 = vmul.f32 %v303_v16, %v286_v4 }
 0x43f   :  { %339 = vrot.lane.b32.xlu0 %v305_v17, %s1370_s12  ;;  %v307_v25 = vmul.f32 0.01, %v305_v17  ;;  %vm306_vm13 = vcmp.gt.f32.partialorder %v305_v17, 0.0 }
 0x441   :  { %v308_v26 = vsel %vm306_vm13, %v305_v17, %v307_v25 }
 0x4b1   :  { %v340_v19 = vpop.permute.xlu0 %339 }
 0x4b2   :  { %1125 = vmatmul.msk.f32.vlgmr.msrb.gmra.mxu2 %vm89_vm3, %v340_v19 }
 0x4b3   :  { %680 = vmatpush.msrb.mxu2 %v1499_v50 }
 0x4b5   :  { %681 = vmatpush.msrb.mxu2 %v1503_v51 }
 0x4b7   :  { %682 = vmatpush.msrb.mxu2 %v1505_v52 }
 0x4b9   :  { %683 = vmatpush.msrb.mxu2 %v1511_v53 }
 0x4ba   :  { %1133 = vmatmul.msk.f32.vlgmr.msra.gmra.mxu2 %vm113_vm2, %v1130_v49 }
 0x4bb   :  { %827 = vmatpush.msra.mxu2 %v1437_v0 }
 0x4bd   :  { %828 = vmatpush.msra.mxu2 %v1439_v1 }
 0x4bf   :  { %829 = vmatpush.msra.mxu2 %v1442_v2 }
 0x4c1   :  { %830 = vmatpush.msra.mxu2 %v1461_v6 }
 0x535   :  { %v360_v21 = vpop.f32.mrf.mxu2 }
 0x536   :  { %v384_v22 = vadd.f32 %v383_v20, %v360_v21 }
 0x538   :  { %v386_v23 = vadd.f32 %v1480_v10, %v384_v22 }
 0x53a   :  { %1189 = vtanh.f32 %v386_v23  ;;  %v1128_v27 = vmul.f32 -1.442695, %v386_v23 }
 0x53c   :  { %1191 = vpow2.f32 %v1128_v27 }
 0x53d   :  { %v501_v57 = vpop.f32.mrf.mxu2 }
 0x540   :  { %v1190_v24 = vpop.eup %1189 }
 0x541   :  { %409 = vrot.lane.b32.xlu1 %v1190_v24, %s1369_s11 }
 0x542   :  { %v1192_v28 = vpop.eup %1191 }
 0x543   :  { %v390_v29 = vadd.f32 1.0, %v1192_v28 }
 0x545   :  { %1193 = vrcp.f32 %v390_v29  ;;  %v402_v35 = vand.u32 2147483648, %v390_v29  ;;  %vm396_vm15 = vweird.f32 %v390_v29  ;;  %v400_v36 = vand.u32 2147483647, %v390_v29 }
 0x547   :  { %v403_v38 = vor.u32 1.1754944e-38, %v402_v35  ;;  %vm401_vm5 = vcmp.eq.f32.partialorder %v400_v36, 8.507059e+37 }
 0x549   :  { %310 = vrot.lane.b32.xlu1 %v308_v26, %s1370_s12 }
 0x54b   :  { %v1194_v30 = vpop.eup %1193 }
 0x54c   :  { %v392_v31 = vmul.f32 %v1194_v30, %v390_v29  ;;  %vm397_vm14 = vweird.f32 %v1194_v30 }
 0x54d   :  { %vm398_vm4 = vmor %vm396_vm15, %vm397_vm14 }
 0x54e   :  { %v393_v32 = vsub.f32 1.0, %v392_v31  ;;  %v1136_v31 = vld [vmem:[%s1680_s0 + $0x8] sm:$0x3] }
 0x550   :  { %v394_v33 = vmul.f32 %v1194_v30, %v393_v32 }
 0x552   :  { %v395_v34 = vadd.f32 %v1194_v30, %v394_v33 }
 0x554   :  { %v399_v37 = vsel %vm398_vm4, %v1194_v30, %v395_v34 }
 0x555   :  { %v404_v40 = vsel %vm401_vm5, %v403_v38, %v399_v37 }
 0x556   :  { %v407_v43 = vmul.f32 %v404_v40, %v299_v11 }
 0x5b3   :  { %v410_v39 = vpop.permute.xlu1 %409 }
 0x5b4   :  { %v412_v41 = vmul.f32 %v410_v39, %v404_v40 }
 0x5b6   :  { %414 = vrot.lane.b32.xlu2 %v412_v41, %s1370_s12 }
 0x5bb   :  { %v311_v42 = vpop.permute.xlu1 %310 }
 0x5bc   :  { %1123 = vmatmul.msk.f32.vlgmr.msrb.gmra.mxu0 %vm89_vm3, %v311_v42 }
 0x5bd   :  { %1138 = vmatpush.msk.msrb.mxu0 %vm117_vm0, %v1447_v3 }
 0x610   :  { %v415_v44 = vpop.permute.xlu2 %414 }
 0x611   :  { %v417_v45 = vadd.f32 %v415_v44, %v407_v43 }
 0x613   :  { %1195 = vtanh.f32 %v417_v45 }
 0x619   :  { %v1196_v46 = vpop.eup %1195 }
 0x61a   :  { %420 = vrot.lane.b32.xlu0 %v1196_v46, %s1369_s11 }
 0x639   :  { %v331_v47 = vpop.f32.mrf.mxu0 }
 0x63a   :  { %v332_v48 = vadd.f32 %v1544_v13, %v331_v47 }
 0x63c   :  { %335 = vst [vmem:[#allocation9 + $0x2] sm:$0x3] %v332_v48 }
 0x68c   :  { %v421_v54 = vpop.permute.xlu0 %420 }
 0x68d   :  { %v423_v55 = vmul.f32 %v421_v54, %v404_v40 }
 0x68f   :  { %457 = vrot.lane.b32.xlu2 %v423_v55, %s1370_s12  ;;  %v425_v62 = vmul.f32 0.01, %v423_v55  ;;  %vm424_vm6 = vcmp.gt.f32.partialorder %v423_v55, 0.0 }
 0x691   :  { %v426_v63 = vsel %vm424_vm6, %v423_v55, %v425_v62 }
 0x6e9   :  { %v458_v56 = vpop.permute.xlu2 %457 }
 0x6ea   :  { %1131 = vmatmul.msk.f32.vlgmr.msra.gmra.mxu0 %vm89_vm3, %v458_v56 }
 0x6eb   :  { %798 = vmatpush.msra.mxu0 %v1499_v50 }
 0x6ed   :  { %799 = vmatpush.msra.mxu0 %v1503_v51 }
 0x6ef   :  { %800 = vmatpush.msra.mxu0 %v1505_v52 }
 0x6f1   :  { %801 = vmatpush.msra.mxu0 %v1511_v53 }
 0x6f2   :  { %1139 = vmatmul.msk.f32.vlgmr.msrb.gmra.mxu0 %vm113_vm2, %v1136_v31 }
 0x6f3   :  { %945 = vmatpush.msrb.mxu0 %v1437_v0 }
 0x6f5   :  { %946 = vmatpush.msrb.mxu0 %v1439_v1 }
 0x6f7   :  { %947 = vmatpush.msrb.mxu0 %v1442_v2 }
 0x6f9   :  { %948 = vmatpush.msrb.mxu0 %v1461_v6 }
 0x767   :  { %v478_v58 = vpop.f32.mrf.mxu0 }
 0x768   :  { %v502_v59 = vadd.f32 %v501_v57, %v478_v58 }
 0x76a   :  { %v504_v60 = vadd.f32 %v1480_v10, %v502_v59 }
 0x76c   :  { %1197 = vtanh.f32 %v504_v60  ;;  %v1134_v4 = vmul.f32 -1.442695, %v504_v60 }
 0x76e   :  { %1199 = vpow2.f32 %v1134_v4  ;;  %v1142_v4 = vld [vmem:[%s1680_s0 + $0xa] sm:$0x3] }
 0x76f   :  { %v619_v33 = vpop.f32.mrf.mxu0 }
 0x772   :  { %v1198_v61 = vpop.eup %1197 }
 0x773   :  { %527 = vrot.lane.b32.xlu0 %v1198_v61, %s1369_s11 }
 0x774   :  { %v1200_v5 = vpop.eup %1199 }
 0x775   :  { %v508_v7 = vadd.f32 1.0, %v1200_v5 }
 0x777   :  { %1201 = vrcp.f32 %v508_v7  ;;  %v520_v15 = vand.u32 2147483648, %v508_v7  ;;  %vm514_vm8 = vweird.f32 %v508_v7  ;;  %v518_v16 = vand.u32 2147483647, %v508_v7 }
 0x779   :  { %v521_v18 = vor.u32 1.1754944e-38, %v520_v15  ;;  %vm519_vm10 = vcmp.eq.f32.partialorder %v518_v16, 8.507059e+37 }
 0x77b   :  { %428 = vrot.lane.b32.xlu0 %v426_v63, %s1370_s12 }
 0x77d   :  { %v1202_v8 = vpop.eup %1201 }
 0x77e   :  { %v510_v9 = vmul.f32 %v1202_v8, %v508_v7  ;;  %vm515_vm7 = vweird.f32 %v1202_v8 }
 0x77f   :  { %vm516_vm9 = vmor %vm514_vm8, %vm515_vm7 }
 0x780   :  { %v511_v11 = vsub.f32 1.0, %v510_v9 }
 0x782   :  { %v512_v12 = vmul.f32 %v1202_v8, %v511_v11 }
 0x784   :  { %v513_v14 = vadd.f32 %v1202_v8, %v512_v12 }
 0x786   :  { %v517_v17 = vsel %vm516_vm9, %v1202_v8, %v513_v14 }
 0x787   :  { %v522_v20 = vsel %vm519_vm10, %v521_v18, %v517_v17 }
 0x788   :  { %v525_v23 = vmul.f32 %v522_v20, %v417_v45 }
 0x7e5   :  { %v528_v19 = vpop.permute.xlu0 %527 }
 0x7e6   :  { %v530_v21 = vmul.f32 %v528_v19, %v522_v20 }
 0x7e8   :  { %532 = vrot.lane.b32.xlu1 %v530_v21, %s1370_s12 }
 0x7ed   :  { %v429_v22 = vpop.permute.xlu0 %428 }
 0x7ee   :  { %1129 = vmatmul.msk.f32.vlgmr.msra.gmra.mxu1 %vm89_vm3, %v429_v22 }
 0x7ef   :  { %1144 = vmatpush.msk.msra.mxu1 %vm117_vm0, %v1447_v3 }
 0x85a   :  { %v533_v24 = vpop.permute.xlu1 %532 }
 0x85b   :  { %v535_v25 = vadd.f32 %v533_v24, %v525_v23 }
 0x85d   :  { %1203 = vtanh.f32 %v535_v25 }
 0x863   :  { %v1204_v26 = vpop.eup %1203 }
 0x864   :  { %538 = vrot.lane.b32.xlu2 %v1204_v26, %s1369_s11 }
 0x86b   :  { %v449_v27 = vpop.f32.mrf.mxu1 }
 0x86c   :  { %v450_v28 = vadd.f32 %v1544_v13, %v449_v27 }
 0x86e   :  { %453 = vst [vmem:[#allocation9 + $0x4] sm:$0x3] %v450_v28 }
 0x8be   :  { %v539_v29 = vpop.permute.xlu2 %538 }
 0x8bf   :  { %v541_v30 = vmul.f32 %v539_v29, %v522_v20 }
 0x8c1   :  { %575 = vrot.lane.b32.xlu1 %v541_v30, %s1370_s12  ;;  %v543_v6 = vmul.f32 0.01, %v541_v30  ;;  %vm542_vm11 = vcmp.gt.f32.partialorder %v541_v30, 0.0 }
 0x8c3   :  { %v544_v35 = vsel %vm542_vm11, %v541_v30, %v543_v6 }
 0x933   :  { %v576_v32 = vpop.permute.xlu1 %575 }
 0x934   :  { %1137 = vmatmul.msk.f32.vlgmr.msrb.gmra.mxu1 %vm89_vm3, %v576_v32 }
 0x935   :  { %916 = vmatpush.msrb.mxu1 %v1499_v50 }
 0x937   :  { %917 = vmatpush.msrb.mxu1 %v1503_v51 }
 0x939   :  { %918 = vmatpush.msrb.mxu1 %v1505_v52 }
 0x93b   :  { %919 = vmatpush.msrb.mxu1 %v1511_v53 }
 0x93c   :  { %1145 = vmatmul.msk.f32.vlgmr.msra.gmra.mxu1 %vm113_vm2, %v1142_v4 }
 0x9b1   :  { %v596_v34 = vpop.f32.mrf.mxu1 }
 0x9b2   :  { %v620_v0 = vadd.f32 %v619_v33, %v596_v34 }
 0x9b4   :  { %v622_v1 = vadd.f32 %v1480_v10, %v620_v0 }
 0x9b6   :  { %1205 = vtanh.f32 %v622_v1  ;;  %v1140_v36 = vmul.f32 -1.442695, %v622_v1  ;;  %v1148_v1 = vld [vmem:[%s1680_s0 + $0xc] sm:$0x3] }
 0x9b8   :  { %1207 = vpow2.f32 %v1140_v36 }
 0x9b9   :  { %v737_v7 = vpop.f32.mrf.mxu1 }
 0x9bc   :  { %v1206_v2 = vpop.eup %1205 }
 0x9bd   :  { %645 = vrot.lane.b32.xlu2 %v1206_v2, %s1369_s11 }
 0x9be   :  { %v1208_v37 = vpop.eup %1207 }
 0x9bf   :  { %v626_v38 = vadd.f32 1.0, %v1208_v37 }
 0x9c1   :  { %1209 = vrcp.f32 %v626_v38  ;;  %v638_v44 = vand.u32 2147483648, %v626_v38  ;;  %vm632_vm13 = vweird.f32 %v626_v38  ;;  %v636_v45 = vand.u32 2147483647, %v626_v38 }
 0x9c3   :  { %v639_v47 = vor.u32 1.1754944e-38, %v638_v44  ;;  %vm637_vm15 = vcmp.eq.f32.partialorder %v636_v45, 8.507059e+37 }
 0x9c5   :  { %546 = vrot.lane.b32.xlu2 %v544_v35, %s1370_s12 }
 0x9c7   :  { %v1210_v39 = vpop.eup %1209 }
 0x9c8   :  { %v628_v40 = vmul.f32 %v1210_v39, %v626_v38  ;;  %vm633_vm12 = vweird.f32 %v1210_v39 }
 0x9c9   :  { %vm634_vm14 = vmor %vm632_vm13, %vm633_vm12 }
 0x9ca   :  { %v629_v41 = vsub.f32 1.0, %v628_v40 }
 0x9cc   :  { %v630_v42 = vmul.f32 %v1210_v39, %v629_v41 }
 0x9ce   :  { %v631_v43 = vadd.f32 %v1210_v39, %v630_v42 }
 0x9d0   :  { %v635_v46 = vsel %vm634_vm14, %v1210_v39, %v631_v43 }
 0x9d1   :  { %v640_v49 = vsel %vm637_vm15, %v639_v47, %v635_v46 }
 0x9d2   :  { %v643_v56 = vmul.f32 %v640_v49, %v535_v25 }
 0xa17   :  { %v646_v48 = vpop.permute.xlu2 %645 }
 0xa18   :  { %v648_v54 = vmul.f32 %v646_v48, %v640_v49 }
 0xa1a   :  { %650 = vrot.lane.b32.xlu0 %v648_v54, %s1370_s12 }
 0xa1f   :  { %v547_v55 = vpop.permute.xlu2 %546 }
 0xa20   :  { %1135 = vmatmul.msk.f32.vlgmr.msra.gmra.mxu3 %vm89_vm3, %v547_v55 }
 0xa21   :  { %1150 = vmatpush.msk.msra.mxu3 %vm117_vm0, %v1447_v3 }
 0xa8c   :  { %v651_v57 = vpop.permute.xlu0 %650 }
 0xa8d   :  { %v653_v58 = vadd.f32 %v651_v57, %v643_v56 }
 0xa8f   :  { %1211 = vtanh.f32 %v653_v58 }
 0xa95   :  { %v1212_v59 = vpop.eup %1211 }
 0xa96   :  { %656 = vrot.lane.b32.xlu1 %v1212_v59, %s1369_s11 }
 0xaa3   :  { %v567_v60 = vpop.f32.mrf.mxu3 }
 0xaa4   :  { %v568_v61 = vadd.f32 %v1544_v13, %v567_v60 }
 0xaa6   :  { %571 = vst [vmem:[#allocation9 + $0x6] sm:$0x3] %v568_v61 }
 0xb08   :  { %v657_v62 = vpop.permute.xlu1 %656 }
 0xb09   :  { %v659_v63 = vmul.f32 %v657_v62, %v640_v49 }
 0xb0b   :  { %693 = vrot.lane.b32.xlu0 %v659_v63, %s1370_s12  ;;  %v661_v14 = vmul.f32 0.01, %v659_v63  ;;  %vm660_vm4 = vcmp.gt.f32.partialorder %v659_v63, 0.0 }
 0xb0d   :  { %v662_v15 = vsel %vm660_vm4, %v659_v63, %v661_v14 }
 0xb7d   :  { %v694_v5 = vpop.permute.xlu0 %693 }
 0xb7e   :  { %1143 = vmatmul.msk.f32.vlgmr.msrb.gmra.mxu3 %vm89_vm3, %v694_v5 }
 0xb7f   :  { %1034 = vmatpush.msrb.mxu3 %v1499_v50 }
 0xb81   :  { %1035 = vmatpush.msrb.mxu3 %v1503_v51 }
 0xb83   :  { %1036 = vmatpush.msrb.mxu3 %v1505_v52 }
 0xb85   :  { %1037 = vmatpush.msrb.mxu3 %v1511_v53 }
 0xb86   :  { %1151 = vmatmul.msk.f32.vlgmr.msra.gmra.mxu3 %vm113_vm2, %v1148_v1 }
 0xc01   :  { %v714_v8 = vpop.f32.mrf.mxu3 }
 0xc02   :  { %v738_v9 = vadd.f32 %v737_v7, %v714_v8  ;;  %v1154_v7 = vld [vmem:[%s1680_s0 + $0xe] sm:$0x3]  ;;  %s1371_s0 = smov 96  }
 0xc04   :  { %v740_v11 = vadd.f32 %v1480_v10, %v738_v9 }
 0xc06   :  { %1213 = vtanh.f32 %v740_v11  ;;  %v1146_v50 = vmul.f32 -1.442695, %v740_v11 }
 0xc08   :  { %1215 = vpow2.f32 %v1146_v50 }
 0xc09   :  { %v855_v2 = vpop.f32.mrf.mxu3 }
 0xc0c   :  { %v1214_v12 = vpop.eup %1213 }
 0xc0d   :  { %763 = vrot.lane.b32.xlu1 %v1214_v12, %s1369_s11 }
 0xc0e   :  { %v1216_v51 = vpop.eup %1215 }
 0xc0f   :  { %v744_v52 = vadd.f32 1.0, %v1216_v51 }
 0xc11   :  { %1217 = vrcp.f32 %v744_v52  ;;  %v756_v20 = vand.u32 2147483648, %v744_v52  ;;  %vm750_vm6 = vweird.f32 %v744_v52  ;;  %v754_v21 = vand.u32 2147483647, %v744_v52 }
 0xc13   :  { %v757_v23 = vor.u32 1.1754944e-38, %v756_v20  ;;  %vm755_vm8 = vcmp.eq.f32.partialorder %v754_v21, 8.507059e+37 }
 0xc15   :  { %664 = vrot.lane.b32.xlu1 %v662_v15, %s1370_s12 }
 0xc17   :  { %v1218_v53 = vpop.eup %1217 }
 0xc18   :  { %v746_v16 = vmul.f32 %v1218_v53, %v744_v52  ;;  %vm751_vm5 = vweird.f32 %v1218_v53 }
 0xc19   :  { %vm752_vm7 = vmor %vm750_vm6, %vm751_vm5 }
 0xc1a   :  { %v747_v17 = vsub.f32 1.0, %v746_v16 }
 0xc1c   :  { %v748_v18 = vmul.f32 %v1218_v53, %v747_v17 }
 0xc1e   :  { %v749_v19 = vadd.f32 %v1218_v53, %v748_v18 }
 0xc20   :  { %v753_v22 = vsel %vm752_vm7, %v1218_v53, %v749_v19 }
 0xc21   :  { %v758_v25 = vsel %vm755_vm8, %v757_v23, %v753_v22 }
 0xc22   :  { %v761_v28 = vmul.f32 %v758_v25, %v653_v58 }
 0xc7f   :  { %v764_v24 = vpop.permute.xlu1 %763 }
 0xc80   :  { %v766_v26 = vmul.f32 %v764_v24, %v758_v25 }
 0xc82   :  { %768 = vrot.lane.b32.xlu2 %v766_v26, %s1370_s12 }
 0xc87   :  { %v665_v27 = vpop.permute.xlu1 %664 }
 0xc88   :  { %1141 = vmatmul.msk.f32.vlgmr.msrb.gmra.mxu2 %vm89_vm3, %v665_v27 }
 0xc89   :  { %1156 = vmatpush.msk.msrb.mxu2 %vm117_vm0, %v1447_v3 }
 0xcdc   :  { %v769_v29 = vpop.permute.xlu2 %768 }
 0xcdd   :  { %v771_v30 = vadd.f32 %v769_v29, %v761_v28 }
 0xcdf   :  { %1219 = vtanh.f32 %v771_v30 }
 0xce5   :  { %v1220_v31 = vpop.eup %1219 }
 0xce6   :  { %774 = vrot.lane.b32.xlu0 %v1220_v31, %s1369_s11 }
 0xd0b   :  { %v685_v32 = vpop.f32.mrf.mxu2 }
 0xd0c   :  { %v686_v33 = vadd.f32 %v1544_v13, %v685_v32 }
 0xd0e   :  { %689 = vst [vmem:[#allocation9 + $0x8] sm:$0x3] %v686_v33 }
 0xd58   :  { %v775_v34 = vpop.permute.xlu0 %774 }
 0xd59   :  { %v777_v0 = vmul.f32 %v775_v34, %v758_v25 }
 0xd5b   :  { %811 = vrot.lane.b32.xlu2 %v777_v0, %s1370_s12  ;;  %v779_v38 = vmul.f32 0.01, %v777_v0  ;;  %vm778_vm0 = vcmp.gt.f32.partialorder %v777_v0, 0.0 }
 0xd5d   :  { %v780_v39 = vsel %vm778_vm0, %v777_v0, %v779_v38 }
 0xdb5   :  { %v812_v3 = vpop.permute.xlu2 %811 }
 0xdb6   :  { %1149 = vmatmul.msk.f32.vlgmr.msra.gmra.mxu2 %vm89_vm3, %v812_v3 }
 0xdbe   :  { %1157 = vmatmul.msk.f32.vlgmr.msrb.gmra.mxu2 %vm113_vm2, %v1154_v7 }
 0xe39   :  { %v832_v6 = vpop.f32.mrf.mxu2 }
 0xe3a   :  { %v856_v35 = vadd.f32 %v855_v2, %v832_v6 }
 0xe3c   :  { %v858_v36 = vadd.f32 %v1480_v10, %v856_v35 }
 0xe3e   :  { %1221 = vtanh.f32 %v858_v36  ;;  %v1152_v40 = vmul.f32 -1.442695, %v858_v36 }
 0xe40   :  { %1223 = vpow2.f32 %v1152_v40 }
 0xe41   :  { %v973_v12 = vpop.f32.mrf.mxu2 }
 0xe44   :  { %v1222_v37 = vpop.eup %1221 }
 0xe45   :  { %881 = vrot.lane.b32.xlu0 %v1222_v37, %s1369_s11 }
 0xe46   :  { %v1224_v41 = vpop.eup %1223 }
 0xe47   :  { %v862_v42 = vadd.f32 1.0, %v1224_v41 }
 0xe49   :  { %1225 = vrcp.f32 %v862_v42  ;;  %v874_v48 = vand.u32 2147483648, %v862_v42  ;;  %vm868_vm10 = vweird.f32 %v862_v42  ;;  %v872_v49 = vand.u32 2147483647, %v862_v42 }
 0xe4b   :  { %v875_v55 = vor.u32 1.1754944e-38, %v874_v48  ;;  %vm873_vm12 = vcmp.eq.f32.partialorder %v872_v49, 8.507059e+37 }
 0xe4d   :  { %782 = vrot.lane.b32.xlu0 %v780_v39, %s1370_s12 }
 0xe4f   :  { %v1226_v43 = vpop.eup %1225 }
 0xe50   :  { %v864_v44 = vmul.f32 %v1226_v43, %v862_v42  ;;  %vm869_vm9 = vweird.f32 %v1226_v43 }
 0xe51   :  { %vm870_vm11 = vmor %vm868_vm10, %vm869_vm9 }
 0xe52   :  { %v865_v45 = vsub.f32 1.0, %v864_v44 }
 0xe54   :  { %v866_v46 = vmul.f32 %v1226_v43, %v865_v45 }
 0xe56   :  { %v867_v47 = vadd.f32 %v1226_v43, %v866_v46 }
 0xe58   :  { %v871_v54 = vsel %vm870_vm11, %v1226_v43, %v867_v47 }
 0xe59   :  { %v876_v57 = vsel %vm873_vm12, %v875_v55, %v871_v54 }
 0xe5a   :  { %v879_v60 = vmul.f32 %v876_v57, %v771_v30 }
 0xeb7   :  { %v882_v56 = vpop.permute.xlu0 %881 }
 0xeb8   :  { %v884_v58 = vmul.f32 %v882_v56, %v876_v57 }
 0xeba   :  { %886 = vrot.lane.b32.xlu1 %v884_v58, %s1370_s12 }
 0xebf   :  { %v783_v59 = vpop.permute.xlu0 %782 }
 0xec0   :  { %1147 = vmatmul.msk.f32.vlgmr.msra.gmra.mxu0 %vm89_vm3, %v783_v59 }
 0xf2c   :  { %v887_v61 = vpop.permute.xlu1 %886 }
 0xf2d   :  { %v889_v62 = vadd.f32 %v887_v61, %v879_v60 }
 0xf2f   :  { %1227 = vtanh.f32 %v889_v62 }
 0xf35   :  { %v1228_v63 = vpop.eup %1227 }
 0xf36   :  { %892 = vrot.lane.b32.xlu2 %v1228_v63, %s1369_s11 }
 0xf3d   :  { %v803_v4 = vpop.f32.mrf.mxu0 }
 0xf3e   :  { %v804_v5 = vadd.f32 %v1544_v13, %v803_v4 }
 0xf40   :  { %807 = vst [vmem:[#allocation9 + $0xa] sm:$0x3] %v804_v5 }
 0xf90   :  { %v893_v8 = vpop.permute.xlu2 %892 }
 0xf91   :  { %v895_v9 = vmul.f32 %v893_v8, %v876_v57 }
 0xf93   :  { %929 = vrot.lane.b32.xlu1 %v895_v9, %s1370_s12  ;;  %v897_v28 = vmul.f32 0.01, %v895_v9  ;;  %vm896_vm4 = vcmp.gt.f32.partialorder %v895_v9, 0.0 }
 0xf95   :  { %v898_v29 = vsel %vm896_vm4, %v895_v9, %v897_v28 }
0x1005   :  { %v930_v11 = vpop.permute.xlu1 %929 }
0x1006   :  { %1155 = vmatmul.msk.f32.vlgmr.msrb.gmra.mxu0 %vm89_vm3, %v930_v11 }
0x1083   :  { %v950_v14 = vpop.f32.mrf.mxu0 }
0x1084   :  { %v974_v15 = vadd.f32 %v973_v12, %v950_v14 }
0x1086   :  { %v976_v50 = vadd.f32 %v1480_v10, %v974_v15 }
0x1088   :  { %1229 = vtanh.f32 %v976_v50  ;;  %v1158_v52 = vmul.f32 -1.442695, %v976_v50 }
0x108a   :  { %1231 = vpow2.f32 %v1158_v52 }
0x108e   :  { %v1230_v51 = vpop.eup %1229 }
0x108f   :  { %999 = vrot.lane.b32.xlu2 %v1230_v51, %s1369_s11 }
0x1090   :  { %v1232_v53 = vpop.eup %1231 }
0x1091   :  { %v980_v16 = vadd.f32 1.0, %v1232_v53 }
0x1093   :  { %1233 = vrcp.f32 %v980_v16  ;;  %v992_v22 = vand.u32 2147483648, %v980_v16  ;;  %vm986_vm13 = vweird.f32 %v980_v16  ;;  %v990_v23 = vand.u32 2147483647, %v980_v16 }
0x1095   :  { %v993_v24 = vor.u32 1.1754944e-38, %v992_v22  ;;  %vm991_vm15 = vcmp.eq.f32.partialorder %v990_v23, 8.507059e+37 }
0x1099   :  { %v1234_v17 = vpop.eup %1233 }
0x109a   :  { %v982_v18 = vmul.f32 %v1234_v17, %v980_v16  ;;  %vm987_vm2 = vweird.f32 %v1234_v17 }
0x109b   :  { %vm988_vm14 = vmor %vm986_vm13, %vm987_vm2 }
0x109c   :  { %v983_v19 = vsub.f32 1.0, %v982_v18 }
0x109e   :  { %v984_v20 = vmul.f32 %v1234_v17, %v983_v19 }
0x10a0   :  { %v985_v21 = vadd.f32 %v1234_v17, %v984_v20 }
0x10a2   :  { %v989_v10 = vsel %vm988_vm14, %v1234_v17, %v985_v21 }
0x10a3   :  { %v994_v26 = vsel %vm991_vm15, %v993_v24, %v989_v10 }
0x10a4   :  { %v997_v30 = vmul.f32 %v994_v26, %v889_v62 }
0x10e9   :  { %v1000_v25 = vpop.permute.xlu2 %999 }
0x10ea   :  { %v1002_v27 = vmul.f32 %v1000_v25, %v994_v26 }
0x10ec   :  { %1004 = vrot.lane.b32.xlu0 %v1002_v27, %s1370_s12 }
0x10f4   :  { %900 = vrot.lane.b32.xlu0 %v898_v29, %s1370_s12 }
0x115e   :  { %v1005_v31 = vpop.permute.xlu0 %1004 }
0x115f   :  { %v1007_v32 = vadd.f32 %v1005_v31, %v997_v30 }
0x1161   :  { %1235 = vtanh.f32 %v1007_v32 }
0x1166   :  { %v901_v33 = vpop.permute.xlu0 %900 }
0x1167   :  { %v1236_v34 = vpop.eup %1235  ;;  %1153 = vmatmul.msk.f32.vlgmr.msrb.gmra.mxu1 %vm89_vm3, %v901_v33 }
0x1168   :  { %1010 = vrot.lane.b32.xlu1 %v1236_v34, %s1369_s11  ;;  %s1093_s11 = sshll.u32 %s1690_s10, 4  ;;  %s1375_s10 = smov 2   ;;  %s1094_s11 = int_to_ptr.hbm [resolvable:$true] %s1093_s11 }
0x11da   :  { %v1011_v0 = vpop.permute.xlu1 %1010 }
0x11db   :  { %v1013_v1 = vmul.f32 %v1011_v0, %v994_v26 }
0x11dd   :  { %1045 = vrot.lane.b32.xlu1 %v1013_v1, %s1370_s12  ;;  %vm1014_vm5 = vcmp.gt.f32.partialorder %v1013_v1, 0.0  ;;  %v1015_v3 = vmul.f32 0.01, %v1013_v1 }
0x11df   :  { %v1016_v2 = vsel %vm1014_vm5, %v1013_v1, %v1015_v3 }
0x11e0   :  { %1018 = vrot.lane.b32.xlu2 %v1016_v2, %s1370_s12 }
0x11e4   :  { %v921_v6 = vpop.f32.mrf.mxu1 }
0x11e5   :  { %v922_v35 = vadd.f32 %v1544_v13, %v921_v6 }
0x11e7   :  { %925 = vst [vmem:[#allocation9 + $0xc] sm:$0x3] %v922_v35 }
0x11e8   :  { %1051 = vrot.lane.b32.xlu2 %v1007_v32, %s1371_s0 }
0x123a   :  { %v1019_v36 = vpop.permute.xlu2 %1018 }
0x123b   :  { %1159 = vmatmul.msk.f32.vlgmr.msrb.gmra.mxu3 %vm89_vm3, %v1019_v36 }
0x1242   :  { %v1052_v37 = vpop.permute.xlu2 %1051 }
0x1243   :  { %1054 = vst.msk [vmem:[#allocation3] sm:$0x3] %vm71_vm1, %v1052_v37 }
0x124a   :  { %v1060_v38 = vld [vmem:[#allocation3] sm:$0x3] }
0x124b   :  { %1061 = vst.msk [vmem:[#allocation12] sm:$0x3] %vm71_vm1, %v1060_v38 }
0x124f   :  { %v1046_v39 = vpop.permute.xlu1 %1045 }
0x1250   :  { %1049 = vst.msk [vmem:[#allocation2] sm:$0x3] %vm71_vm1, %v1046_v39 }
0x1257   :  { %v1058_v40 = vld [vmem:[#allocation2] sm:$0x3] }
0x1258   :  { %1059 = vst.msk [vmem:[#allocation10] sm:$0x3] %vm71_vm1, %v1058_v40 }
0x1259   :  { %1085 = dma.vmem_to_hbm [thread:$0]  %s1081_s25, 32, %s1083_s28, [#allocation11]  }
0x125a   :  { %1096 = dma.vmem_to_hbm [thread:$0]  %s1092_s3, 32, %s1094_s11, [#allocation11]  }
0x12be   :  { %v1039_v41 = vpop.f32.mrf.mxu3 }
0x12bf   :  { %v1040_v42 = vadd.f32 %v1544_v13, %v1039_v41 }
0x12c1   :  { %1043 = vst [vmem:[#allocation9 + $0xe] sm:$0x3] %v1040_v42 }
0x12c2   :  { %1074 = dma.vmem_to_hbm [thread:$0]  %s1067_s14, 256, %s1069_s13, [#allocation6], %s1370_s12, %s1370_s12, %s1375_s10  }
0x12c3   :  { %1361 = dma.done.wait [#allocation6], 256  }
0x12c4   :  { %1362 = vsyncadd [#allocation6], 4294967040 }
0x12c5   :  { %1363 = dma.done.wait [#allocation11], 64  }
0x12c6   :  { %1364 = vsyncadd [#allocation11], 4294967232 }
0x12c7   :  { %1109 = vsyncpa [#allocation5], 1 }
0x12c8   :  { %1110 = vsyncpa [#allocation8], 1 }
0x12c9   :  { %1111 = vsyncpa [#allocation6], 1 }
0x12ca   :  { %1112 = vsyncpa [#allocation11], 1 }

</bundles_post_ra>
